<compile_context>
chip_gen: v7x
topology: tpu7x:2x2x1
jax: 0.10.0
libtpu: 0.0.40
codegen_flags: <defaults>
</compile_context>

<pallas_src>
import jax
import jax.numpy as jnp
from jax.experimental import pallas as pl
from jax.experimental.pallas import tpu as pltpu

INPUT_DIM = 7 * 96        # 672
HIDDEN_DIM = 256
HIDDEN_COUNT = 3
BIAS_LEN = (HIDDEN_COUNT + 1) * HIDDEN_DIM + INPUT_DIM   # 1696

MAX_TILE_B = 1024         # comfortably inside a 32 MiB scoped-VMEM budget on all gens


def _round_up(x, m):
    return ((x + m - 1) // m) * m


def _cdiv(a, b):
    return (a + b - 1) // b


def _choose_tile_b(B):
    """Balanced batch tile: >=2 even grid steps once B>256, tiles <= MAX_TILE_B."""
    if B <= 256:
        return _round_up(B, 8)
    steps = max(2, _cdiv(B, MAX_TILE_B))
    if steps % 2 == 1:
        steps += 1          # even step count keeps v7x's two TensorCores balanced
    return _round_up(_cdiv(B, steps), 8)


def _mlp_kernel(x_ref, t_ref, w0x_ref, w0t_ref, wh_ref, w4_ref, b_ref, o_ref):
    """Fused 5-layer MLP on one (TILE_B, 672) batch tile; weights VMEM-resident."""
    x = x_ref[...]                          # (TB, 672) f32
    t = t_ref[...]                          # (TB, 1)   f32

    # Layer 0: [x, t] @ W0^T + b0  ==  x @ W0x + t * w0_time_row + b0
    h = jnp.dot(x.astype(jnp.bfloat16), w0x_ref[...],
                preferred_element_type=jnp.float32)
    h = h + t * w0t_ref[...] + b_ref[:, 0:HIDDEN_DIM]
    h = jnp.maximum(h, 0.0)

    # Hidden layers 1..HIDDEN_COUNT (statically unrolled)
    for li in range(HIDDEN_COUNT):
        b = b_ref[:, (li + 1) * HIDDEN_DIM:(li + 2) * HIDDEN_DIM]
        h = jnp.dot(h.astype(jnp.bfloat16), wh_ref[li],
                    preferred_element_type=jnp.float32) + b
        h = jnp.maximum(h, 0.0)

    # Output layer (no relu), written as (TB, 672) directly
    b4 = b_ref[:, (HIDDEN_COUNT + 1) * HIDDEN_DIM:]
    out = jnp.dot(h.astype(jnp.bfloat16), w4_ref[...],
                  preferred_element_type=jnp.float32) + b4
    o_ref[...] = out.astype(o_ref.dtype)


def prepare_params(params):
    """Convert PyTorch-convention (out, in) f32 params into kernel operands.

    Called ONCE at weight-load time (outside jit / the sampling loop); the
    prepared operands are then passed to diffuser_forward on every call.
    """
    (w0, b0), (w1, b1), (w2, b2), (w3, b3), (w4, b4) = params
    w0_t = w0.T                                                # (673, 256)
    w0x = w0_t[:INPUT_DIM].astype(jnp.bfloat16)                # (672, 256)
    w0t = w0_t[INPUT_DIM:]                                     # (1, 256) f32 time row
    wh = jnp.stack([w1.T, w2.T, w3.T]).astype(jnp.bfloat16)    # (3, 256, 256)
    w4p = w4.T.astype(jnp.bfloat16)                            # (256, 672)
    b_packed = jnp.concatenate([b0, b1, b2, b3, b4]).reshape(1, BIAS_LEN)
    return w0x, w0t, wh, w4p, b_packed


def diffuser_forward(x, t, w0x, w0t, wh, w4p, b_packed):
    """x: (B, 672) f32, t: (B, 1) f32 -> (B, 672) f32.

    Weight operands come from prepare_params() (hoisted out of this call).
    """
    B = x.shape[0]
    tile_b = _choose_tile_b(B)
    grid = (pl.cdiv(B, tile_b),)

    batch_blk = lambda i: (i, 0)      # tiled over batch
    resident2 = lambda i: (0, 0)      # constant block index -> stays in VMEM
    resident3 = lambda i: (0, 0, 0)
    single = pl.Buffered(1)           # constant-index inputs never re-DMA

    out = pl.pallas_call(
        _mlp_kernel,
        out_shape=jax.ShapeDtypeStruct((B, INPUT_DIM), jnp.float32),
        grid=grid,
        in_specs=[
            pl.BlockSpec((tile_b, INPUT_DIM), batch_blk),                      # x
            pl.BlockSpec((tile_b, 1), batch_blk),                              # t
            pl.BlockSpec((INPUT_DIM, HIDDEN_DIM), resident2,
                         pipeline_mode=single),                                # W0 (x part)
            pl.BlockSpec((1, HIDDEN_DIM), resident2,
                         pipeline_mode=single),                                # W0 (t row)
            pl.BlockSpec((HIDDEN_COUNT, HIDDEN_DIM, HIDDEN_DIM), resident3,
                         pipeline_mode=single),                                # W1..W3
            pl.BlockSpec((HIDDEN_DIM, INPUT_DIM), resident2,
                         pipeline_mode=single),                                # W4
            pl.BlockSpec((1, BIAS_LEN), resident2,
                         pipeline_mode=single),                                # packed biases
        ],
        out_specs=pl.BlockSpec((tile_b, INPUT_DIM), batch_blk),
        compiler_params=pltpu.CompilerParams(
            dimension_semantics=("parallel",),
            vmem_limit_bytes=32 * 1024 * 1024,
        ),
    )(x, t, w0x, w0t, wh, w4p, b_packed)
    return out


def init_params(key):
    """Deterministic init matching the module's layer shapes.

    Weights: kaiming_uniform_ (gain=sqrt(2), bound = gain*sqrt(3/fan_in)).
    Biases: PyTorch Linear default uniform(-1/sqrt(fan_in), 1/sqrt(fan_in)).
    Weight shape convention matches PyTorch: (out_features, in_features).
    """
    dims = [(INPUT_DIM + 1, HIDDEN_DIM)]
    dims += [(HIDDEN_DIM, HIDDEN_DIM)] * HIDDEN_COUNT
    dims += [(HIDDEN_DIM, INPUT_DIM)]

    params = []
    for (fan_in, fan_out) in dims:
        key, kw, kb = jax.random.split(key, 3)
        w_bound = (2.0 ** 0.5) * (3.0 / fan_in) ** 0.5
        w = jax.random.uniform(kw, (fan_out, fan_in), jnp.float32,
                               minval=-w_bound, maxval=w_bound)
        b_bound = 1.0 / (fan_in ** 0.5)
        b = jax.random.uniform(kb, (fan_out,), jnp.float32,
                               minval=-b_bound, maxval=b_bound)
        params.append((w, b))
    return params


def _reference_forward(x, t, params):
    h = jnp.concatenate([x, t], axis=-1)
    for (w, b) in params[:-1]:
        h = jnp.maximum(h @ w.T + b, 0.0)
    w, b = params[-1]
    return h @ w.T + b


def _check(out, ref):
    rel = jnp.linalg.norm(out - ref) / jnp.linalg.norm(ref)
    assert out.shape == ref.shape
    # bf16 weights/activations with f32 accumulation vs the f32 reference.
    assert float(rel) < 1e-2, f"relative error too large: {float(rel)}"


if __name__ == "__main__":
    key = jax.random.PRNGKey(0)
    kp, kx, kt, kx2, kt2 = jax.random.split(key, 5)

    params = init_params(kp)
    # Weight prep is done ONCE here (outside jit), not per forward call.
    prepared = tuple(jax.block_until_ready(p) for p in prepare_params(params))
    fwd = jax.jit(diffuser_forward)

    # Small case (B=8, single grid step)
    B = 8
    x = jax.random.normal(kx, (B, INPUT_DIM), jnp.float32)
    t = jax.random.uniform(kt, (B, 1), jnp.float32)
    out = jax.block_until_ready(fwd(x, t, *prepared))
    _check(out, _reference_forward(x, t, params))

    # Larger case exercising the balanced 2-step "parallel" grid + partial tile
    B2 = 300
    x2 = jax.random.normal(kx2, (B2, INPUT_DIM), jnp.float32)
    t2 = jax.random.uniform(kt2, (B2, 1), jnp.float32)
    out2 = jax.block_until_ready(fwd(x2, t2, *prepared))
    _check(out2, _reference_forward(x2, t2, params))

    print("KERNEL_OK")
</pallas_src>

<mosaic_0001>
module attributes {stable_mosaic.version = 11 : i64} {
  func.func @_mlp_kernel(%arg0: i32, %arg1: memref<8x672xf32, #tpu.memory_space<vmem>>, %arg2: memref<8x1xf32, #tpu.memory_space<vmem>>, %arg3: memref<672x256xbf16, #tpu.memory_space<vmem>>, %arg4: memref<1x256xf32, #tpu.memory_space<vmem>>, %arg5: memref<3x256x256xbf16, #tpu.memory_space<vmem>>, %arg6: memref<256x672xbf16, #tpu.memory_space<vmem>>, %arg7: memref<1x1696xf32, #tpu.memory_space<vmem>>, %arg8: memref<8x672xf32, #tpu.memory_space<vmem>>) attributes {dimension_semantics = [#tpu.dimension_semantics<parallel>], iteration_bounds = array<i64: 1>, scalar_prefetch = 0 : i64, scratch_operands = 0 : i64, tpu.core_type = #tpu.core_type<tc>, window_params = [{transform_indices = @transform_0, window_bounds = array<i64: 8, 672>}, {transform_indices = @transform_1, window_bounds = array<i64: 8, 1>}, {pipeline_mode = #tpu.pipeline_mode<synchronous>, transform_indices = @transform_2, window_bounds = array<i64: 672, 256>}, {pipeline_mode = #tpu.pipeline_mode<synchronous>, transform_indices = @transform_3, window_bounds = array<i64: 1, 256>}, {pipeline_mode = #tpu.pipeline_mode<synchronous>, transform_indices = @transform_4, window_bounds = array<i64: 3, 256, 256>}, {pipeline_mode = #tpu.pipeline_mode<synchronous>, transform_indices = @transform_5, window_bounds = array<i64: 256, 672>}, {pipeline_mode = #tpu.pipeline_mode<synchronous>, transform_indices = @transform_6, window_bounds = array<i64: 1, 1696>}, {transform_indices = @transform_7, window_bounds = array<i64: 8, 672>}]} {
    %c0 = arith.constant 0 : index
    %c0_0 = arith.constant 0 : index
    %0 = vector.load %arg1[%c0, %c0_0] : memref<8x672xf32, #tpu.memory_space<vmem>>, vector<8x672xf32>
    %c0_1 = arith.constant 0 : index
    %c0_2 = arith.constant 0 : index
    %1 = vector.load %arg2[%c0_1, %c0_2] : memref<8x1xf32, #tpu.memory_space<vmem>>, vector<8x1xf32>
    %2 = arith.truncf %0 : vector<8x672xf32> to vector<8x672xbf16>
    %c0_3 = arith.constant 0 : index
    %c0_4 = arith.constant 0 : index
    %3 = vector.load %arg3[%c0_3, %c0_4] : memref<672x256xbf16, #tpu.memory_space<vmem>>, vector<672x256xbf16>
    %cst = arith.constant dense<0.000000e+00> : vector<8x256xf32>
    %4 = tpu.matmul %2, %3, %cst {dimension_numbers = #tpu.dot_dimension_numbers<[1], [0], [0], [1], [0, 0, 1, 1], [], []>} : vector<8x672xbf16>, vector<672x256xbf16>, vector<8x256xf32> -> vector<8x256xf32>
    %c0_5 = arith.constant 0 : index
    %c0_6 = arith.constant 0 : index
    %5 = vector.load %arg4[%c0_5, %c0_6] : memref<1x256xf32, #tpu.memory_space<vmem>>, vector<1x256xf32>
    %6 = vector.broadcast %1 : vector<8x1xf32> to vector<8x256xf32>
    %7 = vector.broadcast %5 : vector<1x256xf32> to vector<8x256xf32>
    %8 = arith.mulf %6, %7 : vector<8x256xf32>
    %9 = arith.addf %4, %8 : vector<8x256xf32>
    %c0_7 = arith.constant 0 : index
    %c0_8 = arith.constant 0 : index
    %10 = vector.load %arg7[%c0_7, %c0_8] : memref<1x1696xf32, #tpu.memory_space<vmem>>, vector<1x256xf32>
    %11 = vector.broadcast %10 : vector<1x256xf32> to vector<8x256xf32>
    %12 = arith.addf %9, %11 : vector<8x256xf32>
    %cst_9 = arith.constant 0.000000e+00 : f32
    %13 = vector.broadcast %cst_9 : f32 to vector<8x256xf32>
    %14 = arith.maximumf %12, %13 : vector<8x256xf32>
    %c0_10 = arith.constant 0 : index
    %c256 = arith.constant 256 : index
    %15 = vector.load %arg7[%c0_10, %c256] : memref<1x1696xf32, #tpu.memory_space<vmem>>, vector<1x256xf32>
    %16 = arith.truncf %14 : vector<8x256xf32> to vector<8x256xbf16>
    %c0_11 = arith.constant 0 : index
    %c0_12 = arith.constant 0 : index
    %c0_13 = arith.constant 0 : index
    %17 = vector.load %arg5[%c0_11, %c0_12, %c0_13] : memref<3x256x256xbf16, #tpu.memory_space<vmem>>, vector<1x256x256xbf16>
    %18 = vector.shape_cast %17 : vector<1x256x256xbf16> to vector<256x256xbf16>
    %cst_14 = arith.constant dense<0.000000e+00> : vector<8x256xf32>
    %19 = tpu.matmul %16, %18, %cst_14 {dimension_numbers = #tpu.dot_dimension_numbers<[1], [0], [0], [1], [0, 0, 1, 1], [], []>} : vector<8x256xbf16>, vector<256x256xbf16>, vector<8x256xf32> -> vector<8x256xf32>
    %20 = vector.broadcast %15 : vector<1x256xf32> to vector<8x256xf32>
    %21 = arith.addf %19, %20 : vector<8x256xf32>
    %cst_15 = arith.constant 0.000000e+00 : f32
    %22 = vector.broadcast %cst_15 : f32 to vector<8x256xf32>
    %23 = arith.maximumf %21, %22 : vector<8x256xf32>
    %c0_16 = arith.constant 0 : index
    %c512 = arith.constant 512 : index
    %24 = vector.load %arg7[%c0_16, %c512] : memref<1x1696xf32, #tpu.memory_space<vmem>>, vector<1x256xf32>
    %25 = arith.truncf %23 : vector<8x256xf32> to vector<8x256xbf16>
    %c1 = arith.constant 1 : index
    %c0_17 = arith.constant 0 : index
    %c0_18 = arith.constant 0 : index
    %26 = vector.load %arg5[%c1, %c0_17, %c0_18] : memref<3x256x256xbf16, #tpu.memory_space<vmem>>, vector<1x256x256xbf16>
    %27 = vector.shape_cast %26 : vector<1x256x256xbf16> to vector<256x256xbf16>
    %cst_19 = arith.constant dense<0.000000e+00> : vector<8x256xf32>
    %28 = tpu.matmul %25, %27, %cst_19 {dimension_numbers = #tpu.dot_dimension_numbers<[1], [0], [0], [1], [0, 0, 1, 1], [], []>} : vector<8x256xbf16>, vector<256x256xbf16>, vector<8x256xf32> -> vector<8x256xf32>
    %29 = vector.broadcast %24 : vector<1x256xf32> to vector<8x256xf32>
    %30 = arith.addf %28, %29 : vector<8x256xf32>
    %cst_20 = arith.constant 0.000000e+00 : f32
    %31 = vector.broadcast %cst_20 : f32 to vector<8x256xf32>
    %32 = arith.maximumf %30, %31 : vector<8x256xf32>
    %c0_21 = arith.constant 0 : index
    %c768 = arith.constant 768 : index
    %33 = vector.load %arg7[%c0_21, %c768] : memref<1x1696xf32, #tpu.memory_space<vmem>>, vector<1x256xf32>
    %34 = arith.truncf %32 : vector<8x256xf32> to vector<8x256xbf16>
    %c2 = arith.constant 2 : index
    %c0_22 = arith.constant 0 : index
    %c0_23 = arith.constant 0 : index
    %35 = vector.load %arg5[%c2, %c0_22, %c0_23] : memref<3x256x256xbf16, #tpu.memory_space<vmem>>, vector<1x256x256xbf16>
    %36 = vector.shape_cast %35 : vector<1x256x256xbf16> to vector<256x256xbf16>
    %cst_24 = arith.constant dense<0.000000e+00> : vector<8x256xf32>
    %37 = tpu.matmul %34, %36, %cst_24 {dimension_numbers = #tpu.dot_dimension_numbers<[1], [0], [0], [1], [0, 0, 1, 1], [], []>} : vector<8x256xbf16>, vector<256x256xbf16>, vector<8x256xf32> -> vector<8x256xf32>
    %38 = vector.broadcast %33 : vector<1x256xf32> to vector<8x256xf32>
    %39 = arith.addf %37, %38 : vector<8x256xf32>
    %cst_25 = arith.constant 0.000000e+00 : f32
    %40 = vector.broadcast %cst_25 : f32 to vector<8x256xf32>
    %41 = arith.maximumf %39, %40 : vector<8x256xf32>
    %c0_26 = arith.constant 0 : index
    %c1024 = arith.constant 1024 : index
    %42 = vector.load %arg7[%c0_26, %c1024] : memref<1x1696xf32, #tpu.memory_space<vmem>>, vector<1x672xf32>
    %43 = arith.truncf %41 : vector<8x256xf32> to vector<8x256xbf16>
    %c0_27 = arith.constant 0 : index
    %c0_28 = arith.constant 0 : index
    %44 = vector.load %arg6[%c0_27, %c0_28] : memref<256x672xbf16, #tpu.memory_space<vmem>>, vector<256x672xbf16>
    %cst_29 = arith.constant dense<0.000000e+00> : vector<8x672xf32>
    %45 = tpu.matmul %43, %44, %cst_29 {dimension_numbers = #tpu.dot_dimension_numbers<[1], [0], [0], [1], [0, 0, 1, 1], [], []>} : vector<8x256xbf16>, vector<256x672xbf16>, vector<8x672xf32> -> vector<8x672xf32>
    %46 = vector.broadcast %42 : vector<1x672xf32> to vector<8x672xf32>
    %47 = arith.addf %45, %46 : vector<8x672xf32>
    %c0_30 = arith.constant 0 : index
    %c0_31 = arith.constant 0 : index
    %48 = vector.load %arg8[%c0_30, %c0_31] : memref<8x672xf32, #tpu.memory_space<vmem>>, vector<8x672xf32>
    tpu.vector_store %arg8[%c0_30, %c0_31], %47 {strides = array<i32>} : memref<8x672xf32, #tpu.memory_space<vmem>>, vector<8x672xf32>,
    return
  }
  func.func @transform_0(%arg0: i32) -> (i32, i32) {
    %c0_i32 = arith.constant 0 : i32
    %c0_i32_0 = arith.constant 0 : i32
    return %arg0, %c0_i32 : i32, i32
  }
  func.func @transform_1(%arg0: i32) -> (i32, i32) {
    %c0_i32 = arith.constant 0 : i32
    %c0_i32_0 = arith.constant 0 : i32
    return %arg0, %c0_i32 : i32, i32
  }
  func.func @transform_2(%arg0: i32) -> (i32, i32) {
    %c0_i32 = arith.constant 0 : i32
    %c0_i32_0 = arith.constant 0 : i32
    %c0_i32_1 = arith.constant 0 : i32
    return %c0_i32, %c0_i32_0 : i32, i32
  }
  func.func @transform_3(%arg0: i32) -> (i32, i32) {
    %c0_i32 = arith.constant 0 : i32
    %c0_i32_0 = arith.constant 0 : i32
    %c0_i32_1 = arith.constant 0 : i32
    return %c0_i32, %c0_i32_0 : i32, i32
  }
  func.func @transform_4(%arg0: i32) -> (i32, i32, i32) {
    %c0_i32 = arith.constant 0 : i32
    %c0_i32_0 = arith.constant 0 : i32
    %c0_i32_1 = arith.constant 0 : i32
    %c0_i32_2 = arith.constant 0 : i32
    return %c0_i32, %c0_i32_0, %c0_i32_1 : i32, i32, i32
  }
  func.func @transform_5(%arg0: i32) -> (i32, i32) {
    %c0_i32 = arith.constant 0 : i32
    %c0_i32_0 = arith.constant 0 : i32
    %c0_i32_1 = arith.constant 0 : i32
    return %c0_i32, %c0_i32_0 : i32, i32
  }
  func.func @transform_6(%arg0: i32) -> (i32, i32) {
    %c0_i32 = arith.constant 0 : i32
    %c0_i32_0 = arith.constant 0 : i32
    %c0_i32_1 = arith.constant 0 : i32
    return %c0_i32, %c0_i32_0 : i32, i32
  }
  func.func @transform_7(%arg0: i32) -> (i32, i32) {
    %c0_i32 = arith.constant 0 : i32
    %c0_i32_0 = arith.constant 0 : i32
    return %arg0, %c0_i32 : i32, i32
  }
}

</mosaic_0001>

<bundles_post_ra>
// kernel: diffuser_forward.1
= control target key start
LH: loop header
LB: loop body
LE: loop exit
PB: predicated region body
PF: predicated region fallthrough
CT: control target
= control target key end

     0   :  { %12 = vsyncpa [#allocation3], 0  ;;  %s3976_s0 = inlined_call_operand.hbm [shape: f32[8,672], index: 0, kind: input, shape index: {}]   ;;  %s3977_s1 = inlined_call_operand.vmem [shape: f32[8,1], index: 1, kind: input, shape index: {}]   ;;  %s3978_s2 = inlined_call_operand.vmem [shape: bf16[672,256], index: 2, kind: input, shape index: {}]   ;;  %s3979_s3 = inlined_call_operand.vmem [shape: f32[1,256], index: 3, kind: input, shape index: {}]   ;;  %s3980_s4 = inlined_call_operand.vmem [shape: bf16[3,256,256], index: 4, kind: input, shape index: {}]   ;;  %s3981_s5 = inlined_call_operand.vmem [shape: bf16[256,672], index: 5, kind: input, shape index: {}]   ;;  %s3982_s6 = inlined_call_operand.vmem [shape: f32[1,1696], index: 6, kind: input, shape index: {}]   ;;  %s3983_s7 = inlined_call_operand.hbm [shape: f32[8,672], index: 7, kind: output, shape index: {}]  }
   0x1   :  { %13 = vsyncpa [#allocation4], 0  ;;  %s3029_s24 = smov [#allocation2]   ;;  %s2981_s28 = scalar_lea.hbm %s3976_s0, 768 }
   0x2   :  { %s20_s25 = sshll.u32 %s3029_s24, 4  ;;  %p2982_p0 = scmp.ne.s32.totalorder %s3976_s0, %s2981_s28  ;;  %s21_s25 = int_to_ptr.vmem [resolvable:$true] %s20_s25 }
   0x3   :  { %p2985_p1 = scmp.lt.u32.totalorder %s2981_s28, %s3976_s0 }
   0x5   :  { %p2987_p2 = pnand %p2985_p1, %p2982_p0 }
   0x7   :  { %2990 = shalt.err (!%p2987_p2)
}
   0x8   :  { %s2991_s10 = scalar_lea.vmem %s21_s25, 768  ;;  %p2996_p4 = scmp.lt.s32.totalorder %s21_s25, %s21_s25 }
   0x9   :  { %p2992_p3 = scmp.ne.s32.totalorder %s21_s25, %s2991_s10  ;;  %p2997_p5 = scmp.lt.s32.totalorder %s2991_s10, %s2991_s10 }
   0xb   :  { %p2998_p6 = por %p2997_p5, %p2996_p4 }
   0xd   :  { %p2999_p7 = pnand %p2998_p6, %p2992_p3 }
   0xf   :  { %3002 = shalt.err (!%p2999_p7)
}
  0x10   :  { %23 = dma.hbm_to_vmem [thread:$0]  %s3976_s0, 768, %s21_s25, [#allocation3]  }
  0x11   :  { %3025 = dma.done.wait [#allocation3], 768  }
  0x12   :  { %3026 = vsyncadd [#allocation3], 4294966528  ;;  %v3030_v0 = vmov 0   ;;  %v2567_v1 = vld [vmem:[%s3978_s2 + $0x4] ss:$8 sps:$4 sm:$0xff]   ;;  %v43_v51 = vld [vmem:[#allocation2 + $0x18] sm:$0xff] }
  0x13   :  { %2566 = vset.pattern.permute.xlu0 %v3030_v0  ;;  %v2569_v2 = vld [vmem:[%s3978_s2] ss:$8 sps:$4 sm:$0xff]   ;;  %580 = vmatprep.subr.bf16.mxu0 %v2567_v1  ;;  %v2570_v3 = vld [vmem:[%s3978_s2 + $0x104] ss:$8 sps:$4 sm:$0xff]   ;;  %v2573_v5 = vld [vmem:[%s3978_s2 + $0x14] ss:$8 sps:$4 sm:$0xff]   ;;  %v50_v53 = vpack.c.bf16 %v43_v51, %v43_v51 }
  0x14   :  { %v2572_v4 = vld [vmem:[%s3978_s2 + $0x100] ss:$8 sps:$4 sm:$0xff]   ;;  %581 = vmatpush1.bf16.msra.mxu0 %v2569_v2  ;;  %v2575_v6 = vld [vmem:[%s3978_s2 + $0x10] ss:$8 sps:$4 sm:$0xff]   ;;  %621 = vmatprep.subr.bf16.mxu1 %v2570_v3  ;;  %v2576_v7 = vld [vmem:[%s3978_s2 + $0x114] ss:$8 sps:$4 sm:$0xff]  }
  0x15   :  { %622 = vmatpush1.bf16.msra.mxu1 %v2572_v4  ;;  %582 = vmatprep.subr.bf16.mxu0 %v2573_v5  ;;  %v2578_v8 = vld [vmem:[%s3978_s2 + $0x110] ss:$8 sps:$4 sm:$0xff]   ;;  %v2579_v9 = vld [vmem:[%s3978_s2 + $0x24] ss:$8 sps:$4 sm:$0xff]   ;;  %v2581_v10 = vld [vmem:[%s3978_s2 + $0x20] ss:$8 sps:$4 sm:$0xff]  }
  0x16   :  { %623 = vmatprep.subr.bf16.mxu1 %v2576_v7  ;;  %v2582_v11 = vld [vmem:[%s3978_s2 + $0x124] ss:$8 sps:$4 sm:$0xff]   ;;  %v2585_v12 = vld [vmem:[%s3978_s2 + $0x34] ss:$8 sps:$4 sm:$0xff]   ;;  %v2584_v13 = vld [vmem:[%s3978_s2 + $0x120] ss:$8 sps:$4 sm:$0xff]   ;;  %653 = vmatprep.mubr.bf16.mxu1 %v50_v53 }
  0x17   :  { %v2588_v14 = vld [vmem:[%s3978_s2 + $0x134] ss:$8 sps:$4 sm:$0xff]   ;;  %v2587_v15 = vld [vmem:[%s3978_s2 + $0x30] ss:$8 sps:$4 sm:$0xff]   ;;  %v2591_v16 = vld [vmem:[%s3978_s2 + $0x44] ss:$8 sps:$4 sm:$0xff]  }
  0x18   :  { %583 = vmatpush1.bf16.msra.mxu0 %v2575_v6  ;;  %v2590_v17 = vld [vmem:[%s3978_s2 + $0x130] ss:$8 sps:$4 sm:$0xff]   ;;  %v2594_v18 = vld [vmem:[%s3978_s2 + $0x144] ss:$8 sps:$4 sm:$0xff]   ;;  %v2593_v19 = vld [vmem:[%s3978_s2 + $0x40] ss:$8 sps:$4 sm:$0xff]  }
  0x19   :  { %584 = vmatprep.subr.bf16.mxu0 %v2579_v9  ;;  %624 = vmatpush1.bf16.msra.mxu1 %v2578_v8  ;;  %v2597_v20 = vld [vmem:[%s3978_s2 + $0x54] ss:$8 sps:$4 sm:$0xff]   ;;  %v2596_v21 = vld [vmem:[%s3978_s2 + $0x140] ss:$8 sps:$4 sm:$0xff]   ;;  %v2599_v23 = vld [vmem:[%s3978_s2 + $0x50] ss:$8 sps:$4 sm:$0xff]  }
  0x1a   :  { %625 = vmatprep.subr.bf16.mxu1 %v2582_v11  ;;  %v2600_v22 = vld [vmem:[%s3978_s2 + $0x154] ss:$8 sps:$4 sm:$0xff]   ;;  %v2603_v24 = vld [vmem:[%s3978_s2 + $0x64] ss:$8 sps:$4 sm:$0xff]   ;;  %v2602_v25 = vld [vmem:[%s3978_s2 + $0x150] ss:$8 sps:$4 sm:$0xff]  }
  0x1b   :  { %v2606_v26 = vld [vmem:[%s3978_s2 + $0x164] ss:$8 sps:$4 sm:$0xff]   ;;  %v2605_v27 = vld [vmem:[%s3978_s2 + $0x60] ss:$8 sps:$4 sm:$0xff]   ;;  %v2609_v28 = vld [vmem:[%s3978_s2 + $0x74] ss:$8 sps:$4 sm:$0xff]  }
  0x1c   :  { %585 = vmatpush1.bf16.msra.mxu0 %v2581_v10  ;;  %v2608_v29 = vld [vmem:[%s3978_s2 + $0x160] ss:$8 sps:$4 sm:$0xff]   ;;  %v2612_v30 = vld [vmem:[%s3978_s2 + $0x174] ss:$8 sps:$4 sm:$0xff]   ;;  %v2611_v31 = vld [vmem:[%s3978_s2 + $0x70] ss:$8 sps:$4 sm:$0xff]  }
  0x1d   :  { %586 = vmatprep.subr.bf16.mxu0 %v2585_v12  ;;  %626 = vmatpush1.bf16.msra.mxu1 %v2584_v13  ;;  %v2615_v32 = vld [vmem:[%s3978_s2 + $0x84] ss:$8 sps:$4 sm:$0xff]   ;;  %v2614_v33 = vld [vmem:[%s3978_s2 + $0x170] ss:$8 sps:$4 sm:$0xff]   ;;  %v2617_v35 = vld [vmem:[%s3978_s2 + $0x80] ss:$8 sps:$4 sm:$0xff]  }
  0x1e   :  { %627 = vmatprep.subr.bf16.mxu1 %v2588_v14  ;;  %v2618_v34 = vld [vmem:[%s3978_s2 + $0x184] ss:$8 sps:$4 sm:$0xff]   ;;  %v2621_v36 = vld [vmem:[%s3978_s2 + $0x94] ss:$8 sps:$4 sm:$0xff]   ;;  %v2620_v37 = vld [vmem:[%s3978_s2 + $0x180] ss:$8 sps:$4 sm:$0xff]  }
  0x1f   :  { %v2624_v38 = vld [vmem:[%s3978_s2 + $0x194] ss:$8 sps:$4 sm:$0xff]   ;;  %v2623_v39 = vld [vmem:[%s3978_s2 + $0x90] ss:$8 sps:$4 sm:$0xff]   ;;  %v2627_v40 = vld [vmem:[%s3978_s2 + $0xa4] ss:$8 sps:$4 sm:$0xff]  }
  0x20   :  { %587 = vmatpush1.bf16.msra.mxu0 %v2587_v15  ;;  %v2626_v41 = vld [vmem:[%s3978_s2 + $0x190] ss:$8 sps:$4 sm:$0xff]   ;;  %v2630_v42 = vld [vmem:[%s3978_s2 + $0x1a4] ss:$8 sps:$4 sm:$0xff]   ;;  %v2629_v43 = vld [vmem:[%s3978_s2 + $0xa0] ss:$8 sps:$4 sm:$0xff]  }
  0x21   :  { %588 = vmatprep.subr.bf16.mxu0 %v2591_v16  ;;  %628 = vmatpush1.bf16.msra.mxu1 %v2590_v17  ;;  %v2633_v44 = vld [vmem:[%s3978_s2 + $0xb4] ss:$8 sps:$4 sm:$0xff]   ;;  %v2632_v45 = vld [vmem:[%s3978_s2 + $0x1a0] ss:$8 sps:$4 sm:$0xff]   ;;  %v2635_v48 = vld [vmem:[%s3978_s2 + $0xb0] ss:$8 sps:$4 sm:$0xff]  }
  0x22   :  { %629 = vmatprep.subr.bf16.mxu1 %v2594_v18  ;;  %v2636_v46 = vld [vmem:[%s3978_s2 + $0x1b4] ss:$8 sps:$4 sm:$0xff]   ;;  %v41_v47 = vld [vmem:[#allocation2 + $0x8] sm:$0xff]  ;;  %v2638_v52 = vld [vmem:[%s3978_s2 + $0x1b0] ss:$8 sps:$4 sm:$0xff]   ;;  %vm576_vm0 = vcmask 261120  }
  0x23   :  { %v48_v49 = vpack.c.bf16 %v41_v47, %v41_v47  ;;  %v2639_v50 = vld [vmem:[%s3978_s2 + $0xc4] ss:$8 sps:$4 sm:$0xff]   ;;  %v2641_v55 = vld [vmem:[%s3978_s2 + $0xc0] ss:$8 sps:$4 sm:$0xff]   ;;  %v2645_v56 = vld [vmem:[%s3978_s2 + $0xd4] ss:$8 sps:$4 sm:$0xff]  }
  0x24   :  { %589 = vmatpush1.bf16.msra.mxu0 %v2593_v19  ;;  %v2642_v54 = vld [vmem:[%s3978_s2 + $0x1c4] ss:$8 sps:$4 sm:$0xff]   ;;  %v2644_v57 = vld [vmem:[%s3978_s2 + $0x1c0] ss:$8 sps:$4 sm:$0xff]   ;;  %v2648_v58 = vld [vmem:[%s3978_s2 + $0x1d4] ss:$8 sps:$4 sm:$0xff]  }
  0x25   :  { %590 = vmatprep.subr.bf16.mxu0 %v2597_v20  ;;  %630 = vmatpush1.bf16.msra.mxu1 %v2596_v21  ;;  %v2647_v59 = vld [vmem:[%s3978_s2 + $0xd0] ss:$8 sps:$4 sm:$0xff]   ;;  %v2651_v60 = vld [vmem:[%s3978_s2 + $0xe4] ss:$8 sps:$4 sm:$0xff]   ;;  %v2653_v63 = vld [vmem:[%s3978_s2 + $0xe0] ss:$8 sps:$4 sm:$0xff]  }
  0x26   :  { %631 = vmatprep.subr.bf16.mxu1 %v2600_v22  ;;  %612 = vmatprep.mubr.bf16.mxu0 %v48_v49  ;;  %v2650_v61 = vld [vmem:[%s3978_s2 + $0x1d0] ss:$8 sps:$4 sm:$0xff]   ;;  %v2654_v62 = vld [vmem:[%s3978_s2 + $0x1e4] ss:$8 sps:$4 sm:$0xff]   ;;  %v2657_v0 = vld [vmem:[%s3978_s2 + $0xf4] ss:$8 sps:$4 sm:$0xff]  }
  0x27   :  { %v2656_v1 = vld [vmem:[%s3978_s2 + $0x1e0] ss:$8 sps:$4 sm:$0xff]   ;;  %v2659_v2 = vld [vmem:[%s3978_s2 + $0xf0] ss:$8 sps:$4 sm:$0xff]   ;;  %v2660_v3 = vld [vmem:[%s3978_s2 + $0x1f4] ss:$8 sps:$4 sm:$0xff]  }
  0x28   :  { %591 = vmatpush1.bf16.msra.mxu0 %v2599_v23  ;;  %v46_v4 = vld [vmem:[%s3977_s1] sm:$0xff]  ;;  %v2662_v5 = vld [vmem:[%s3978_s2 + $0x1f0] ss:$8 sps:$4 sm:$0xff]   ;;  %v45_v8 = vld [vmem:[#allocation2 + $0x28] sm:$0xff] }
  0x29   :  { %592 = vmatprep.subr.bf16.mxu0 %v2603_v24  ;;  %632 = vmatpush1.bf16.msra.mxu1 %v2602_v25  ;;  %v40_v6 = vld [vmem:[#allocation2] sm:$0xff]  ;;  %v42_v9 = vld [vmem:[#allocation2 + $0x10] sm:$0xff]  ;;  %v52_v14 = vpack.c.bf16 %v45_v8, %v45_v8 }
  0x2a   :  { %633 = vmatprep.subr.bf16.mxu1 %v2606_v26  ;;  %140 = vperm.xlu0 %2566, %v46_v4   ;;  %v2665_v7 = vld [vmem:[%s3978_s2 + $0x204] ss:$8 sps:$4 sm:$0xff]   ;;  %v47_v10 = vpack.c.bf16 %v40_v6, %v40_v6  ;;  %v2663_v11 = vld [vmem:[%s3978_s2 + $0x200] ss:$8 sps:$4 sm:$0xff]   ;;  %v2668_v13 = vld [vmem:[%s3978_s2 + $0x214] ss:$8 sps:$4 sm:$0xff]   ;;  %v49_v16 = vpack.c.bf16 %v42_v9, %v42_v9 }
  0x2b   :  { %v2695_v12 = vld [vmem:[%s3980_s4 + $0x4] ss:$8 sps:$4 sm:$0xff]   ;;  %v2693_v15 = vld [vmem:[%s3980_s4] ss:$8 sps:$4 sm:$0xff]   ;;  %v2698_v17 = vld [vmem:[%s3980_s4 + $0x14] ss:$8 sps:$4 sm:$0xff]  }
  0x2c   :  { %593 = vmatpush1.bf16.msra.mxu0 %v2605_v27  ;;  %v2666_v18 = vld [vmem:[%s3978_s2 + $0x210] ss:$8 sps:$4 sm:$0xff]   ;;  %v2671_v19 = vld [vmem:[%s3978_s2 + $0x224] ss:$8 sps:$4 sm:$0xff]   ;;  %v2669_v22 = vld [vmem:[%s3978_s2 + $0x220] ss:$8 sps:$4 sm:$0xff]  }
  0x2d   :  { %594 = vmatprep.subr.bf16.mxu0 %v2609_v28  ;;  %634 = vmatpush1.bf16.msra.mxu1 %v2608_v29  ;;  %v2696_v20 = vld [vmem:[%s3980_s4 + $0x10] ss:$8 sps:$4 sm:$0xff]   ;;  %v2701_v21 = vld [vmem:[%s3980_s4 + $0x24] ss:$8 sps:$4 sm:$0xff]   ;;  %v2674_v23 = vld [vmem:[%s3978_s2 + $0x234] ss:$8 sps:$4 sm:$0xff]  }
  0x2e   :  { %635 = vmatprep.subr.bf16.mxu1 %v2612_v30  ;;  %v2699_v24 = vld [vmem:[%s3980_s4 + $0x20] ss:$8 sps:$4 sm:$0xff]   ;;  %v2704_v25 = vld [vmem:[%s3980_s4 + $0x34] ss:$8 sps:$4 sm:$0xff]   ;;  %v2672_v26 = vld [vmem:[%s3978_s2 + $0x230] ss:$8 sps:$4 sm:$0xff]  }
  0x2f   :  { %v2677_v27 = vld [vmem:[%s3978_s2 + $0x244] ss:$8 sps:$4 sm:$0xff]   ;;  %v2702_v28 = vld [vmem:[%s3980_s4 + $0x30] ss:$8 sps:$4 sm:$0xff]   ;;  %v2675_v29 = vld [vmem:[%s3978_s2 + $0x240] ss:$8 sps:$4 sm:$0xff]  }
  0x30   :  { %595 = vmatpush1.bf16.msra.mxu0 %v2611_v31  ;;  %v2680_v30 = vld [vmem:[%s3978_s2 + $0x254] ss:$8 sps:$4 sm:$0xff]   ;;  %v2678_v31 = vld [vmem:[%s3978_s2 + $0x250] ss:$8 sps:$4 sm:$0xff]   ;;  %v2711_v47 = vld [vmem:[%s3980_s4 + $0x60] ss:$8 sps:$4 sm:$0xff]  }
  0x31   :  { %596 = vmatprep.subr.bf16.mxu0 %v2615_v32  ;;  %636 = vmatpush1.bf16.msra.mxu1 %v2614_v33  ;;  %v2683_v32 = vld [vmem:[%s3978_s2 + $0x264] ss:$8 sps:$4 sm:$0xff]   ;;  %v2681_v33 = vld [vmem:[%s3978_s2 + $0x260] ss:$8 sps:$4 sm:$0xff]   ;;  %v2714_v49 = vld [vmem:[%s3980_s4 + $0x70] ss:$8 sps:$4 sm:$0xff]  }
  0x32   :  { %637 = vmatprep.subr.bf16.mxu1 %v2618_v34  ;;  %v2686_v34 = vld [vmem:[%s3978_s2 + $0x274] ss:$8 sps:$4 sm:$0xff]   ;;  %v2717_v51 = vld [vmem:[%s3980_s4 + $0x80] ss:$8 sps:$4 sm:$0xff]   ;;  %v2720_v53 = vld [vmem:[%s3980_s4 + $0x90] ss:$8 sps:$4 sm:$0xff]  }
  0x33   :  { %v2746_v4 = vld [vmem:[%s3980_s4 + $0x114] ss:$8 sps:$4 sm:$0xff]   ;;  %v2749_v6 = vld [vmem:[%s3980_s4 + $0x124] ss:$8 sps:$4 sm:$0xff]   ;;  %v2750_v9 = vld [vmem:[%s3980_s4 + $0x130] ss:$8 sps:$4 sm:$0xff]  }
  0x34   :  { %597 = vmatpush1.bf16.msra.mxu0 %v2617_v35  ;;  %v2684_v35 = vld [vmem:[%s3978_s2 + $0x270] ss:$8 sps:$4 sm:$0xff]   ;;  %v2752_v8 = vld [vmem:[%s3980_s4 + $0x134] ss:$8 sps:$4 sm:$0xff]  }
  0x35   :  { %598 = vmatprep.subr.bf16.mxu0 %v2621_v36  ;;  %638 = vmatpush1.bf16.msra.mxu1 %v2620_v37  ;;  %v2689_v36 = vld [vmem:[%s3978_s2 + $0x284] ss:$8 sps:$4 sm:$0xff]   ;;  %v2687_v37 = vld [vmem:[%s3978_s2 + $0x280] ss:$8 sps:$4 sm:$0xff]  }
  0x36   :  { %639 = vmatprep.subr.bf16.mxu1 %v2624_v38  ;;  %v2692_v38 = vld [vmem:[%s3978_s2 + $0x294] ss:$8 sps:$4 sm:$0xff]  }
  0x38   :  { %599 = vmatpush1.bf16.msra.mxu0 %v2623_v39  ;;  %v2690_v39 = vld [vmem:[%s3978_s2 + $0x290] ss:$8 sps:$4 sm:$0xff]  }
  0x39   :  { %600 = vmatprep.subr.bf16.mxu0 %v2627_v40  ;;  %640 = vmatpush1.bf16.msra.mxu1 %v2626_v41  ;;  %v44_v40 = vld [vmem:[#allocation2 + $0x20] sm:$0xff] }
  0x3a   :  { %641 = vmatprep.subr.bf16.mxu1 %v2630_v42  ;;  %v51_v41 = vpack.c.bf16 %v44_v40, %v44_v40  ;;  %v2707_v42 = vld [vmem:[%s3980_s4 + $0x44] ss:$8 sps:$4 sm:$0xff]  }
  0x3c   :  { %601 = vmatpush1.bf16.msra.mxu0 %v2629_v43  ;;  %v2705_v43 = vld [vmem:[%s3980_s4 + $0x40] ss:$8 sps:$4 sm:$0xff]  }
  0x3d   :  { %602 = vmatprep.subr.bf16.mxu0 %v2633_v44  ;;  %642 = vmatpush1.bf16.msra.mxu1 %v2632_v45  ;;  %v2708_v44 = vld [vmem:[%s3980_s4 + $0x50] ss:$8 sps:$4 sm:$0xff]   ;;  %v2710_v45 = vld [vmem:[%s3980_s4 + $0x54] ss:$8 sps:$4 sm:$0xff]  }
  0x3e   :  { %643 = vmatprep.subr.bf16.mxu1 %v2636_v46  ;;  %v2713_v46 = vld [vmem:[%s3980_s4 + $0x64] ss:$8 sps:$4 sm:$0xff]  }
  0x40   :  { %603 = vmatpush1.bf16.msra.mxu0 %v2635_v48  ;;  %v2716_v48 = vld [vmem:[%s3980_s4 + $0x74] ss:$8 sps:$4 sm:$0xff]  }
  0x41   :  { %604 = vmatprep.subr.bf16.mxu0 %v2639_v50  ;;  %644 = vmatpush1.bf16.msra.mxu1 %v2638_v52  ;;  %v2719_v50 = vld [vmem:[%s3980_s4 + $0x84] ss:$8 sps:$4 sm:$0xff]   ;;  %v2722_v52 = vld [vmem:[%s3980_s4 + $0x94] ss:$8 sps:$4 sm:$0xff]  }
  0x42   :  { %645 = vmatprep.subr.bf16.mxu1 %v2642_v54  ;;  %v2725_v54 = vld [vmem:[%s3980_s4 + $0xa4] ss:$8 sps:$4 sm:$0xff]  }
  0x44   :  { %605 = vmatpush1.bf16.msra.mxu0 %v2641_v55  ;;  %v2723_v55 = vld [vmem:[%s3980_s4 + $0xa0] ss:$8 sps:$4 sm:$0xff]  }
  0x45   :  { %606 = vmatprep.subr.bf16.mxu0 %v2645_v56  ;;  %646 = vmatpush1.bf16.msra.mxu1 %v2644_v57  ;;  %v2728_v56 = vld [vmem:[%s3980_s4 + $0xb4] ss:$8 sps:$4 sm:$0xff]   ;;  %v2726_v57 = vld [vmem:[%s3980_s4 + $0xb0] ss:$8 sps:$4 sm:$0xff]  }
  0x46   :  { %647 = vmatprep.subr.bf16.mxu1 %v2648_v58  ;;  %v2731_v58 = vld [vmem:[%s3980_s4 + $0xc4] ss:$8 sps:$4 sm:$0xff]  }
  0x48   :  { %607 = vmatpush1.bf16.msra.mxu0 %v2647_v59  ;;  %v2729_v59 = vld [vmem:[%s3980_s4 + $0xc0] ss:$8 sps:$4 sm:$0xff]  }
  0x49   :  { %608 = vmatprep.subr.bf16.mxu0 %v2651_v60  ;;  %648 = vmatpush1.bf16.msra.mxu1 %v2650_v61  ;;  %v2734_v60 = vld [vmem:[%s3980_s4 + $0xd4] ss:$8 sps:$4 sm:$0xff]   ;;  %v2732_v61 = vld [vmem:[%s3980_s4 + $0xd0] ss:$8 sps:$4 sm:$0xff]  }
  0x4a   :  { %649 = vmatprep.subr.bf16.mxu1 %v2654_v62  ;;  %v2737_v62 = vld [vmem:[%s3980_s4 + $0xe4] ss:$8 sps:$4 sm:$0xff]  }
  0x4c   :  { %609 = vmatpush1.bf16.msra.mxu0 %v2653_v63  ;;  %v2735_v63 = vld [vmem:[%s3980_s4 + $0xe0] ss:$8 sps:$4 sm:$0xff]  }
  0x4d   :  { %610 = vmatprep.subr.bf16.mxu0 %v2657_v0  ;;  %650 = vmatpush1.bf16.msra.mxu1 %v2656_v1  ;;  %v2740_v0 = vld [vmem:[%s3980_s4 + $0xf4] ss:$8 sps:$4 sm:$0xff]   ;;  %v2738_v1 = vld [vmem:[%s3980_s4 + $0xf0] ss:$8 sps:$4 sm:$0xff]  }
  0x4e   :  { %651 = vmatprep.subr.bf16.mxu1 %v2660_v3  ;;  %v2743_v3 = vld [vmem:[%s3980_s4 + $0x104] ss:$8 sps:$4 sm:$0xff]  }
  0x50   :  { %611 = vmatpush1.bf16.msra.mxu0 %v2659_v2  ;;  %v2741_v2 = vld [vmem:[%s3980_s4 + $0x100] ss:$8 sps:$4 sm:$0xff]  }
  0x51   :  { %662 = vmatprep.subr.bf16.mxu0 %v2665_v7  ;;  %652 = vmatpush1.bf16.msra.mxu1 %v2662_v5  ;;  %v2744_v5 = vld [vmem:[%s3980_s4 + $0x110] ss:$8 sps:$4 sm:$0xff]   ;;  %v2747_v7 = vld [vmem:[%s3980_s4 + $0x120] ss:$8 sps:$4 sm:$0xff]  }
  0x52   :  { %925 = vmatprep.subr.bf16.mxu1 %v2695_v12  ;;  %v2758_v12 = vld [vmem:[%s3980_s4 + $0x154] ss:$8 sps:$4 sm:$0xff]  }
  0x53   :  { %613 = vmatmul.mubr.bf16.vlgmr.msra.gmra.mrb[0].mxu0 %v47_v10  ;;  %v2755_v10 = vld [vmem:[%s3980_s4 + $0x144] ss:$8 sps:$4 sm:$0xff]  }
  0x54   :  { %663 = vmatpush1.bf16.msra.mxu0 %v2663_v11  ;;  %2306 = vmatprep.mubr.msk.bf16.mxu0 %vm576_vm0, %v52_v14  ;;  %v2753_v11 = vld [vmem:[%s3980_s4 + $0x140] ss:$8 sps:$4 sm:$0xff]   ;;  %v2761_v14 = vld [vmem:[%s3980_s4 + $0x164] ss:$8 sps:$4 sm:$0xff]  }
  0x55   :  { %654 = vmatmul.mubr.bf16.vlgmr.msra.gmra.mrb[0].mxu1 %v49_v16  ;;  %664 = vmatprep.subr.bf16.mxu0 %v2668_v13  ;;  %v2756_v13 = vld [vmem:[%s3980_s4 + $0x150] ss:$8 sps:$4 sm:$0xff]   ;;  %v2764_v16 = vld [vmem:[%s3980_s4 + $0x174] ss:$8 sps:$4 sm:$0xff]  }
  0x56   :  { %926 = vmatpush1.bf16.msra.mxu1 %v2693_v15  ;;  %v2759_v15 = vld [vmem:[%s3980_s4 + $0x160] ss:$8 sps:$4 sm:$0xff]  }
  0x57   :  { %927 = vmatprep.subr.bf16.mxu1 %v2698_v17  ;;  %v2762_v17 = vld [vmem:[%s3980_s4 + $0x170] ss:$8 sps:$4 sm:$0xff]  }
  0x58   :  { %665 = vmatpush1.bf16.msra.mxu0 %v2666_v18  ;;  %v2767_v18 = vld [vmem:[%s3980_s4 + $0x184] ss:$8 sps:$4 sm:$0xff]  }
  0x59   :  { %666 = vmatprep.subr.bf16.mxu0 %v2671_v19  ;;  %v2765_v19 = vld [vmem:[%s3980_s4 + $0x180] ss:$8 sps:$4 sm:$0xff]  }
  0x5a   :  { %928 = vmatpush1.bf16.msra.mxu1 %v2696_v20  ;;  %v2770_v20 = vld [vmem:[%s3980_s4 + $0x194] ss:$8 sps:$4 sm:$0xff]  }
  0x5b   :  { %929 = vmatprep.subr.bf16.mxu1 %v2701_v21  ;;  %v2768_v21 = vld [vmem:[%s3980_s4 + $0x190] ss:$8 sps:$4 sm:$0xff]  }
  0x5c   :  { %667 = vmatpush1.bf16.msra.mxu0 %v2669_v22  ;;  %v2773_v22 = vld [vmem:[%s3980_s4 + $0x1a4] ss:$8 sps:$4 sm:$0xff]  }
  0x5d   :  { %668 = vmatprep.subr.bf16.mxu0 %v2674_v23  ;;  %v2771_v23 = vld [vmem:[%s3980_s4 + $0x1a0] ss:$8 sps:$4 sm:$0xff]  }
  0x5e   :  { %930 = vmatpush1.bf16.msra.mxu1 %v2699_v24  ;;  %v2776_v24 = vld [vmem:[%s3980_s4 + $0x1b4] ss:$8 sps:$4 sm:$0xff]  }
  0x5f   :  { %931 = vmatprep.subr.bf16.mxu1 %v2704_v25  ;;  %v2774_v25 = vld [vmem:[%s3980_s4 + $0x1b0] ss:$8 sps:$4 sm:$0xff]  }
  0x60   :  { %669 = vmatpush1.bf16.msra.mxu0 %v2672_v26  ;;  %v2779_v26 = vld [vmem:[%s3980_s4 + $0x1c4] ss:$8 sps:$4 sm:$0xff]  }
  0x61   :  { %670 = vmatprep.subr.bf16.mxu0 %v2677_v27  ;;  %v2777_v27 = vld [vmem:[%s3980_s4 + $0x1c0] ss:$8 sps:$4 sm:$0xff]  }
  0x62   :  { %932 = vmatpush1.bf16.msra.mxu1 %v2702_v28  ;;  %v2782_v28 = vld [vmem:[%s3980_s4 + $0x1d4] ss:$8 sps:$4 sm:$0xff]  }
  0x63   :  { %933 = vmatprep.subr.bf16.mxu1 %v2707_v42 }
  0x64   :  { %671 = vmatpush1.bf16.msra.mxu0 %v2675_v29  ;;  %v2780_v29 = vld [vmem:[%s3980_s4 + $0x1d0] ss:$8 sps:$4 sm:$0xff]  }
  0x65   :  { %672 = vmatprep.subr.bf16.mxu0 %v2680_v30  ;;  %v144_v30 = vlaneseq }
  0x66   :  { %934 = vmatpush1.bf16.msra.mxu1 %v2705_v43 }
  0x67   :  { %935 = vmatprep.subr.bf16.mxu1 %v2710_v45 }
  0x68   :  { %673 = vmatpush1.bf16.msra.mxu0 %v2678_v31  ;;  %v3520_v31 = vshrl.u32 %v144_v30, 7  ;;  %v2822_v30 = vld [vmem:[%s3980_s4 + $0x2b0] ss:$8 sps:$4 sm:$0xff]  }
  0x69   :  { %674 = vmatprep.subr.bf16.mxu0 %v2683_v32 }
  0x6a   :  { %936 = vmatpush1.bf16.msra.mxu1 %v2708_v44  ;;  %v3523_v32 = vsub.s32 0, %v3520_v31 }
  0x6b   :  { %937 = vmatprep.subr.bf16.mxu1 %v2713_v46 }
  0x6c   :  { %675 = vmatpush1.bf16.msra.mxu0 %v2681_v33  ;;  %v137_v33 = vld [vmem:[%s3979_s3] sm:$0x3] }
  0x6d   :  { %676 = vmatprep.subr.bf16.mxu0 %v2686_v34  ;;  %v3529_v34 = vsub.s32 1, %v3520_v31 }
  0x6e   :  { %938 = vmatpush1.bf16.msra.mxu1 %v2711_v47 }
  0x6f   :  { %939 = vmatprep.subr.bf16.mxu1 %v2716_v48 }
  0x70   :  { %677 = vmatpush1.bf16.msra.mxu0 %v2684_v35  ;;  %v147_v35 = vrot.slane %v137_v33, %v3523_v32 }
  0x71   :  { %678 = vmatprep.subr.bf16.mxu0 %v2689_v36  ;;  %v151_v36 = vrot.slane %v137_v33, %v3529_v34  ;;  %v2827_v33 = vld [vmem:[%s3980_s4 + $0x2c4] ss:$8 sps:$4 sm:$0xff]  }
  0x72   :  { %940 = vmatpush1.bf16.msra.mxu1 %v2714_v49 }
  0x73   :  { %941 = vmatprep.subr.bf16.mxu1 %v2719_v50 }
  0x74   :  { %679 = vmatpush1.bf16.msra.mxu0 %v2687_v37 }
  0x75   :  { %680 = vmatprep.subr.bf16.mxu0 %v2692_v38 }
  0x76   :  { %942 = vmatpush1.bf16.msra.mxu1 %v2717_v51 }
  0x77   :  { %943 = vmatprep.subr.bf16.mxu1 %v2722_v52  ;;  %v703_v52 = vld [vmem:[%s3982_s6] sm:$0x3] }
  0x78   :  { %681 = vmatpush1.bf16.msra.mxu0 %v2690_v39 }
  0x79   :  { %1175 = vmatprep.subr.bf16.mxu0 %v2743_v3  ;;  %v2785_v3 = vld [vmem:[%s3980_s4 + $0x1e4] ss:$8 sps:$4 sm:$0xff]  }
  0x7a   :  { %944 = vmatpush1.bf16.msra.mxu1 %v2720_v53  ;;  %v708_v53 = vrot.slane %v703_v52, %v3523_v32 }
  0x7b   :  { %695 = vmatmul.mubr.bf16.vlgmr.msra.gmra.mrb[4].mxu0 %v51_v41  ;;  %945 = vmatprep.subr.bf16.mxu1 %v2725_v54 }
  0x7c   :  { %1176 = vmatpush1.bf16.msra.mxu0 %v2741_v2 }
  0x7d   :  { %1177 = vmatprep.subr.bf16.mxu0 %v2746_v4  ;;  %v2783_v4 = vld [vmem:[%s3980_s4 + $0x1e0] ss:$8 sps:$4 sm:$0xff]  }
  0x7e   :  { %946 = vmatpush1.bf16.msra.mxu1 %v2723_v55  ;;  %v712_v55 = vrot.slane %v703_v52, %v3529_v34  ;;  %v2831_v52 = vld [vmem:[%s3980_s4 + $0x2e0] ss:$8 sps:$4 sm:$0xff]  }
  0x7f   :  { %947 = vmatprep.subr.bf16.mxu1 %v2728_v56 }
  0x80   :  { %1178 = vmatpush1.bf16.msra.mxu0 %v2744_v5  ;;  %v2788_v5 = vld [vmem:[%s3980_s4 + $0x1f4] ss:$8 sps:$4 sm:$0xff]  }
  0x81   :  { %1179 = vmatprep.subr.bf16.mxu0 %v2749_v6  ;;  %v2786_v6 = vld [vmem:[%s3980_s4 + $0x1f0] ss:$8 sps:$4 sm:$0xff]  }
  0x82   :  { %948 = vmatpush1.bf16.msra.mxu1 %v2726_v57 }
  0x83   :  { %949 = vmatprep.subr.bf16.mxu1 %v2731_v58 }
  0x84   :  { %1180 = vmatpush1.bf16.msra.mxu0 %v2747_v7  ;;  %v2789_v7 = vld [vmem:[%s3980_s4 + $0x200] ss:$8 sps:$4 sm:$0xff]  }
  0x85   :  { %1181 = vmatprep.subr.bf16.mxu0 %v2752_v8  ;;  %v2791_v8 = vld [vmem:[%s3980_s4 + $0x204] ss:$8 sps:$4 sm:$0xff]  }
  0x86   :  { %950 = vmatpush1.bf16.msra.mxu1 %v2729_v59 }
  0x87   :  { %951 = vmatprep.subr.bf16.mxu1 %v2734_v60 }
  0x88   :  { %1182 = vmatpush1.bf16.msra.mxu0 %v2750_v9  ;;  %v2794_v9 = vld [vmem:[%s3980_s4 + $0x214] ss:$8 sps:$4 sm:$0xff]  }
  0x89   :  { %1183 = vmatprep.subr.bf16.mxu0 %v2755_v10  ;;  %v2792_v10 = vld [vmem:[%s3980_s4 + $0x210] ss:$8 sps:$4 sm:$0xff]  }
  0x8a   :  { %952 = vmatpush1.bf16.msra.mxu1 %v2732_v61 }
  0x8b   :  { %953 = vmatprep.subr.bf16.mxu1 %v2737_v62 }
  0x8c   :  { %1184 = vmatpush1.bf16.msra.mxu0 %v2753_v11  ;;  %v2797_v11 = vld [vmem:[%s3980_s4 + $0x224] ss:$8 sps:$4 sm:$0xff]  }
  0x8d   :  { %1185 = vmatprep.subr.bf16.mxu0 %v2758_v12  ;;  %v2795_v12 = vld [vmem:[%s3980_s4 + $0x220] ss:$8 sps:$4 sm:$0xff]  }
  0x8e   :  { %954 = vmatpush1.bf16.msra.mxu1 %v2735_v63 }
  0x8f   :  { %955 = vmatprep.subr.bf16.mxu1 %v2740_v0 }
  0x90   :  { %1186 = vmatpush1.bf16.msra.mxu0 %v2756_v13  ;;  %v2800_v13 = vld [vmem:[%s3980_s4 + $0x234] ss:$8 sps:$4 sm:$0xff]  }
  0x91   :  { %1187 = vmatprep.subr.bf16.mxu0 %v2761_v14  ;;  %v2798_v14 = vld [vmem:[%s3980_s4 + $0x230] ss:$8 sps:$4 sm:$0xff]  }
  0x92   :  { %956 = vmatpush1.bf16.msra.mxu1 %v2738_v1 }
  0x93   :  { %1425 = vmatprep.subr.bf16.mxu1 %v2791_v8  ;;  %v2887_v8 = vld [vmem:[%s3981_s5 + $0x184] ss:$24 sps:$4 sm:$0xff]  }
  0x94   :  { %1188 = vmatpush1.bf16.msra.mxu0 %v2759_v15  ;;  %v2803_v15 = vld [vmem:[%s3980_s4 + $0x244] ss:$8 sps:$4 sm:$0xff]  }
  0x95   :  { %1189 = vmatprep.subr.bf16.mxu0 %v2764_v16  ;;  %v2801_v16 = vld [vmem:[%s3980_s4 + $0x240] ss:$8 sps:$4 sm:$0xff]  }
  0x98   :  { %1190 = vmatpush1.bf16.msra.mxu0 %v2762_v17  ;;  %v2806_v17 = vld [vmem:[%s3980_s4 + $0x254] ss:$8 sps:$4 sm:$0xff]  }
  0x99   :  { %1191 = vmatprep.subr.bf16.mxu0 %v2767_v18  ;;  %v2804_v18 = vld [vmem:[%s3980_s4 + $0x250] ss:$8 sps:$4 sm:$0xff]  }
  0x9c   :  { %1192 = vmatpush1.bf16.msra.mxu0 %v2765_v19  ;;  %v2809_v19 = vld [vmem:[%s3980_s4 + $0x264] ss:$8 sps:$4 sm:$0xff]  }
  0x9d   :  { %1193 = vmatprep.subr.bf16.mxu0 %v2770_v20  ;;  %v2807_v20 = vld [vmem:[%s3980_s4 + $0x260] ss:$8 sps:$4 sm:$0xff]  }
  0xa0   :  { %1194 = vmatpush1.bf16.msra.mxu0 %v2768_v21  ;;  %v2812_v21 = vld [vmem:[%s3980_s4 + $0x274] ss:$8 sps:$4 sm:$0xff]  }
  0xa1   :  { %1195 = vmatprep.subr.bf16.mxu0 %v2773_v22  ;;  %v2810_v22 = vld [vmem:[%s3980_s4 + $0x270] ss:$8 sps:$4 sm:$0xff]  }
  0xa4   :  { %1196 = vmatpush1.bf16.msra.mxu0 %v2771_v23  ;;  %v2815_v23 = vld [vmem:[%s3980_s4 + $0x284] ss:$8 sps:$4 sm:$0xff]  }
  0xa5   :  { %1197 = vmatprep.subr.bf16.mxu0 %v2776_v24  ;;  %v2813_v24 = vld [vmem:[%s3980_s4 + $0x280] ss:$8 sps:$4 sm:$0xff]  }
  0xa8   :  { %1198 = vmatpush1.bf16.msra.mxu0 %v2774_v25  ;;  %v2818_v25 = vld [vmem:[%s3980_s4 + $0x294] ss:$8 sps:$4 sm:$0xff]  }
  0xa9   :  { %1199 = vmatprep.subr.bf16.mxu0 %v2779_v26  ;;  %v141_v37 = vpop.permute.xlu0 %140  ;;  %v2816_v26 = vld [vmem:[%s3980_s4 + $0x290] ss:$8 sps:$4 sm:$0xff]  }
  0xaa   :  { %v154_v38 = vmul.f32 %v147_v35, %v141_v37  ;;  %v155_v39 = vmul.f32 %v151_v36, %v141_v37  ;;  %v2825_v35 = vld [vmem:[%s3980_s4 + $0x2c0] ss:$8 sps:$4 sm:$0xff]   ;;  %v2830_v36 = vld [vmem:[%s3980_s4 + $0x2d4] ss:$8 sps:$4 sm:$0xff]   ;;  %v2828_v37 = vld [vmem:[%s3980_s4 + $0x2d0] ss:$8 sps:$4 sm:$0xff]  }
  0xac   :  { %1200 = vmatpush1.bf16.msra.mxu0 %v2777_v27  ;;  %v2821_v27 = vld [vmem:[%s3980_s4 + $0x2a4] ss:$8 sps:$4 sm:$0xff]  }
  0xad   :  { %1201 = vmatprep.subr.bf16.mxu0 %v2782_v28  ;;  %v2819_v28 = vld [vmem:[%s3980_s4 + $0x2a0] ss:$8 sps:$4 sm:$0xff]  }
  0xb0   :  { %1202 = vmatpush1.bf16.msra.mxu0 %v2780_v29  ;;  %v2824_v29 = vld [vmem:[%s3980_s4 + $0x2b4] ss:$8 sps:$4 sm:$0xff]  }
  0xb1   :  { %1203 = vmatprep.subr.bf16.mxu0 %v2785_v3  ;;  %v2867_v3 = vld [vmem:[%s3981_s5 + $0xf0] ss:$24 sps:$4 sm:$0xff]  }
  0xb4   :  { %1204 = vmatpush1.bf16.msra.mxu0 %v2783_v4  ;;  %v2875_v4 = vld [vmem:[%s3981_s5 + $0x124] ss:$24 sps:$4 sm:$0xff]  }
  0xb5   :  { %1205 = vmatprep.subr.bf16.mxu0 %v2788_v5  ;;  %v2873_v5 = vld [vmem:[%s3981_s5 + $0x120] ss:$24 sps:$4 sm:$0xff]  }
  0xb8   :  { %1206 = vmatpush1.bf16.msra.mxu0 %v2786_v6  ;;  %v2881_v6 = vld [vmem:[%s3981_s5 + $0x154] ss:$24 sps:$4 sm:$0xff]  }
 0x126   :  { %v614_v40 = vpop.f32.mrb[0].mxu0 }
 0x127   :  { %v615_v41 = vadd.f32 %v614_v40, %v154_v38  ;;  %v616_v42 = vpop.f32.mrb[1].mxu0  ;;  %v719_v38 = vld [vmem:[%s3982_s6 + $0x2] sm:$0x3] }
 0x128   :  { %v617_v43 = vadd.f32 %v616_v42, %v155_v39  ;;  %v618_v44 = vpop.f32.mrb[2].mxu0  ;;  %v655_v45 = vpop.f32.mrb[0].mxu1  ;;  %v758_v39 = vrot.slane %v719_v38, %v3523_v32  ;;  %v762_v40 = vrot.slane %v719_v38, %v3529_v34  ;;  %v2846_v38 = vld [vmem:[%s3981_s5 + $0x38] ss:$24 sps:$4 sm:$0xff]  }
 0x129   :  { %v656_v46 = vadd.f32 %v655_v45, %v615_v41  ;;  %v619_v47 = vpop.f32.mrb[3].mxu0  ;;  %v657_v48 = vpop.f32.mrb[1].mxu1 }
 0x12a   :  { %v658_v49 = vadd.f32 %v657_v48, %v617_v43  ;;  %v659_v50 = vpop.f32.mrb[2].mxu1 }
 0x12b   :  { %v660_v51 = vpop.f32.mrb[3].mxu1 }
 0x12c   :  { %v2833_v51 = vld [vmem:[%s3980_s4 + $0x2e4] ss:$8 sps:$4 sm:$0xff]  }
 0x14e   :  { %v696_v54 = vpop.f32.mrb[4].mxu0 }
 0x14f   :  { %v697_v56 = vadd.f32 %v696_v54, %v656_v46  ;;  %v698_v57 = vpop.f32.mrb[5].mxu0  ;;  %v2834_v54 = vld [vmem:[%s3980_s4 + $0x2f0] ss:$8 sps:$4 sm:$0xff]  }
 0x150   :  { %v699_v58 = vadd.f32 %v698_v57, %v658_v49  ;;  %v700_v59 = vpop.f32.mrb[6].mxu0  ;;  %v2842_v57 = vld [vmem:[%s3981_s5 + $0xc] ss:$24 sps:$4 sm:$0xff]  }
 0x151   :  { %v715_v60 = vadd.f32 %v708_v53, %v697_v56  ;;  %v701_v61 = vpop.f32.mrb[7].mxu0  ;;  %v2836_v53 = vld [vmem:[%s3980_s4 + $0x2f4] ss:$8 sps:$4 sm:$0xff]   ;;  %v2843_v59 = vld [vmem:[%s3981_s5 + $0x30] ss:$24 sps:$4 sm:$0xff]  }
 0x152   :  { %v716_v62 = vadd.f32 %v712_v55, %v699_v58  ;;  %v2837_v55 = vld [vmem:[%s3981_s5] ss:$24 sps:$4 sm:$0xff]   ;;  %v2839_v56 = vld [vmem:[%s3981_s5 + $0x4] ss:$24 sps:$4 sm:$0xff]   ;;  %v2845_v58 = vld [vmem:[%s3981_s5 + $0x34] ss:$24 sps:$4 sm:$0xff]  }
 0x153   :  { %v717_v63 = vmax.f32 %v715_v60, 0.0  ;;  %2078 = vmatprep.subr.bf16.mxu0 %v2839_v56  ;;  %v2851_v60 = vld [vmem:[%s3981_s5 + $0x64] ss:$24 sps:$4 sm:$0xff]   ;;  %v2849_v61 = vld [vmem:[%s3981_s5 + $0x60] ss:$24 sps:$4 sm:$0xff]  }
 0x154   :  { %v718_v0 = vmax.f32 %v716_v62, 0.0  ;;  %v2857_v62 = vld [vmem:[%s3981_s5 + $0x94] ss:$24 sps:$4 sm:$0xff]   ;;  %v2900_v56 = vld [vmem:[%s3981_s5 + $0x1e8] ss:$24 sps:$4 sm:$0xff]  }
 0x155   :  { %v720_v2 = vpack.c.bf16 %v717_v63, %v717_v63  ;;  %v2855_v63 = vld [vmem:[%s3981_s5 + $0x90] ss:$24 sps:$4 sm:$0xff]  }
 0x156   :  { %v721_v1 = vpack.c.bf16 %v718_v0, %v718_v0  ;;  %v2863_v0 = vld [vmem:[%s3981_s5 + $0xc4] ss:$24 sps:$4 sm:$0xff]  }
 0x158   :  { %957 = vmatprep.mubr.bf16.mxu1 %v721_v1  ;;  %v2861_v1 = vld [vmem:[%s3981_s5 + $0xc0] ss:$24 sps:$4 sm:$0xff]  }
 0x159   :  { %958 = vmatmul.mubr.bf16.vlgmr.msra.gmra.mrb[4].mxu1 %v720_v2  ;;  %v2869_v2 = vld [vmem:[%s3981_s5 + $0xf4] ss:$24 sps:$4 sm:$0xff]  }
 0x15a   :  { %1426 = vmatpush1.bf16.msra.mxu1 %v2789_v7  ;;  %v2879_v7 = vld [vmem:[%s3981_s5 + $0x150] ss:$24 sps:$4 sm:$0xff]  }
 0x15b   :  { %1427 = vmatprep.subr.bf16.mxu1 %v2794_v9  ;;  %v2885_v9 = vld [vmem:[%s3981_s5 + $0x180] ss:$24 sps:$4 sm:$0xff]  }
 0x15e   :  { %1428 = vmatpush1.bf16.msra.mxu1 %v2792_v10  ;;  %v2893_v10 = vld [vmem:[%s3981_s5 + $0x1b4] ss:$24 sps:$4 sm:$0xff]  }
 0x15f   :  { %1429 = vmatprep.subr.bf16.mxu1 %v2797_v11  ;;  %v2891_v11 = vld [vmem:[%s3981_s5 + $0x1b0] ss:$24 sps:$4 sm:$0xff]  }
 0x162   :  { %1430 = vmatpush1.bf16.msra.mxu1 %v2795_v12  ;;  %v2899_v12 = vld [vmem:[%s3981_s5 + $0x1e4] ss:$24 sps:$4 sm:$0xff]  }
 0x163   :  { %1431 = vmatprep.subr.bf16.mxu1 %v2800_v13  ;;  %v2897_v13 = vld [vmem:[%s3981_s5 + $0x1e0] ss:$24 sps:$4 sm:$0xff]  }
 0x166   :  { %1432 = vmatpush1.bf16.msra.mxu1 %v2798_v14  ;;  %v2905_v14 = vld [vmem:[%s3981_s5 + $0x214] ss:$24 sps:$4 sm:$0xff]  }
 0x167   :  { %1433 = vmatprep.subr.bf16.mxu1 %v2803_v15  ;;  %v2903_v15 = vld [vmem:[%s3981_s5 + $0x210] ss:$24 sps:$4 sm:$0xff]  }
 0x16a   :  { %1434 = vmatpush1.bf16.msra.mxu1 %v2801_v16  ;;  %v2911_v16 = vld [vmem:[%s3981_s5 + $0x244] ss:$24 sps:$4 sm:$0xff]  }
 0x16b   :  { %1435 = vmatprep.subr.bf16.mxu1 %v2806_v17  ;;  %v2909_v17 = vld [vmem:[%s3981_s5 + $0x240] ss:$24 sps:$4 sm:$0xff]  }
 0x16e   :  { %1436 = vmatpush1.bf16.msra.mxu1 %v2804_v18  ;;  %v2917_v18 = vld [vmem:[%s3981_s5 + $0x274] ss:$24 sps:$4 sm:$0xff]  }
 0x16f   :  { %1437 = vmatprep.subr.bf16.mxu1 %v2809_v19  ;;  %v2915_v19 = vld [vmem:[%s3981_s5 + $0x270] ss:$24 sps:$4 sm:$0xff]  }
 0x172   :  { %1438 = vmatpush1.bf16.msra.mxu1 %v2807_v20  ;;  %v968_v20 = vld [vmem:[%s3982_s6 + $0x4] sm:$0x3] }
 0x173   :  { %1439 = vmatprep.subr.bf16.mxu1 %v2812_v21  ;;  %v1008_v21 = vrot.slane %v968_v20, %v3523_v32 }
 0x176   :  { %1440 = vmatpush1.bf16.msra.mxu1 %v2810_v22  ;;  %v1012_v22 = vrot.slane %v968_v20, %v3529_v34  ;;  %v2933_v20 = vld [vmem:[%s3981_s5 + $0x10] ss:$24 sps:$4 sm:$0xff]  }
 0x177   :  { %1441 = vmatprep.subr.bf16.mxu1 %v2815_v23 }
 0x17a   :  { %1442 = vmatpush1.bf16.msra.mxu1 %v2813_v24 }
 0x17b   :  { %1443 = vmatprep.subr.bf16.mxu1 %v2818_v25 }
 0x17e   :  { %1444 = vmatpush1.bf16.msra.mxu1 %v2816_v26 }
 0x17f   :  { %1445 = vmatprep.subr.bf16.mxu1 %v2821_v27 }
 0x182   :  { %1446 = vmatpush1.bf16.msra.mxu1 %v2819_v28 }
 0x183   :  { %1447 = vmatprep.subr.bf16.mxu1 %v2824_v29 }
 0x186   :  { %1448 = vmatpush1.bf16.msra.mxu1 %v2822_v30 }
 0x187   :  { %1449 = vmatprep.subr.bf16.mxu1 %v2827_v33 }
 0x18a   :  { %1450 = vmatpush1.bf16.msra.mxu1 %v2825_v35  ;;  %v2840_v35 = vld [vmem:[%s3981_s5 + $0x8] ss:$24 sps:$4 sm:$0xff]  }
 0x18b   :  { %1451 = vmatprep.subr.bf16.mxu1 %v2830_v36 }
 0x18e   :  { %1452 = vmatpush1.bf16.msra.mxu1 %v2828_v37  ;;  %v2848_v37 = vld [vmem:[%s3981_s5 + $0x3c] ss:$24 sps:$4 sm:$0xff]  }
 0x18f   :  { %1453 = vmatprep.subr.bf16.mxu1 %v2833_v51  ;;  %v2890_v51 = vld [vmem:[%s3981_s5 + $0x18c] ss:$24 sps:$4 sm:$0xff]  }
 0x192   :  { %1454 = vmatpush1.bf16.msra.mxu1 %v2831_v52  ;;  %v2888_v52 = vld [vmem:[%s3981_s5 + $0x188] ss:$24 sps:$4 sm:$0xff]  }
 0x193   :  { %1455 = vmatprep.subr.bf16.mxu1 %v2836_v53  ;;  %v2896_v53 = vld [vmem:[%s3981_s5 + $0x1bc] ss:$24 sps:$4 sm:$0xff]  }
 0x196   :  { %1456 = vmatpush1.bf16.msra.mxu1 %v2834_v54  ;;  %v2894_v54 = vld [vmem:[%s3981_s5 + $0x1b8] ss:$24 sps:$4 sm:$0xff]  }
 0x197   :  { %2119 = vmatprep.subr.bf16.mxu1 %v2842_v57  ;;  %v2908_v57 = vld [vmem:[%s3981_s5 + $0x21c] ss:$24 sps:$4 sm:$0xff]  }
 0x22c   :  { %v959_v41 = vpop.f32.mrb[4].mxu1 }
 0x22d   :  { %v960_v42 = vadd.f32 %v959_v41, %v758_v39  ;;  %v961_v43 = vpop.f32.mrb[5].mxu1  ;;  %v2854_v39 = vld [vmem:[%s3981_s5 + $0x6c] ss:$24 sps:$4 sm:$0xff]   ;;  %v2860_v41 = vld [vmem:[%s3981_s5 + $0x9c] ss:$24 sps:$4 sm:$0xff]  }
 0x22e   :  { %v962_v44 = vadd.f32 %v961_v43, %v762_v40  ;;  %v963_v45 = vpop.f32.mrb[6].mxu1  ;;  %v2852_v40 = vld [vmem:[%s3981_s5 + $0x68] ss:$24 sps:$4 sm:$0xff]   ;;  %v2866_v43 = vld [vmem:[%s3981_s5 + $0xcc] ss:$24 sps:$4 sm:$0xff]  }
 0x22f   :  { %v966_v46 = vmax.f32 %v960_v42, 0.0  ;;  %v964_v47 = vpop.f32.mrb[7].mxu1  ;;  %v2858_v42 = vld [vmem:[%s3981_s5 + $0x98] ss:$24 sps:$4 sm:$0xff]   ;;  %v2872_v45 = vld [vmem:[%s3981_s5 + $0xfc] ss:$24 sps:$4 sm:$0xff]  }
 0x230   :  { %v967_v48 = vmax.f32 %v962_v44, 0.0  ;;  %v2864_v44 = vld [vmem:[%s3981_s5 + $0xc8] ss:$24 sps:$4 sm:$0xff]   ;;  %v2878_v47 = vld [vmem:[%s3981_s5 + $0x12c] ss:$24 sps:$4 sm:$0xff]  }
 0x231   :  { %v969_v50 = vpack.c.bf16 %v966_v46, %v966_v46  ;;  %v2870_v46 = vld [vmem:[%s3981_s5 + $0xf8] ss:$24 sps:$4 sm:$0xff]  }
 0x232   :  { %v970_v49 = vpack.c.bf16 %v967_v48, %v967_v48  ;;  %v2876_v48 = vld [vmem:[%s3981_s5 + $0x128] ss:$24 sps:$4 sm:$0xff]  }
 0x234   :  { %1207 = vmatprep.mubr.bf16.mxu0 %v970_v49  ;;  %v2884_v49 = vld [vmem:[%s3981_s5 + $0x15c] ss:$24 sps:$4 sm:$0xff]  }
 0x235   :  { %1208 = vmatmul.mubr.bf16.vlgmr.msra.gmra.mrb[8].mxu0 %v969_v50  ;;  %v2882_v50 = vld [vmem:[%s3981_s5 + $0x158] ss:$24 sps:$4 sm:$0xff]  }
 0x236   :  { %2079 = vmatpush1.bf16.msra.mxu0 %v2837_v55  ;;  %v2902_v55 = vld [vmem:[%s3981_s5 + $0x1ec] ss:$24 sps:$4 sm:$0xff]  }
 0x237   :  { %2080 = vmatprep.subr.bf16.mxu0 %v2845_v58  ;;  %v2906_v58 = vld [vmem:[%s3981_s5 + $0x218] ss:$24 sps:$4 sm:$0xff]  }
 0x23a   :  { %2081 = vmatpush1.bf16.msra.mxu0 %v2843_v59  ;;  %v2914_v59 = vld [vmem:[%s3981_s5 + $0x24c] ss:$24 sps:$4 sm:$0xff]  }
 0x23b   :  { %2082 = vmatprep.subr.bf16.mxu0 %v2851_v60  ;;  %v2912_v60 = vld [vmem:[%s3981_s5 + $0x248] ss:$24 sps:$4 sm:$0xff]  }
 0x23e   :  { %2083 = vmatpush1.bf16.msra.mxu0 %v2849_v61  ;;  %v2920_v61 = vld [vmem:[%s3981_s5 + $0x27c] ss:$24 sps:$4 sm:$0xff]  }
 0x23f   :  { %2084 = vmatprep.subr.bf16.mxu0 %v2857_v62  ;;  %v2918_v62 = vld [vmem:[%s3981_s5 + $0x278] ss:$24 sps:$4 sm:$0xff]  }
 0x242   :  { %2085 = vmatpush1.bf16.msra.mxu0 %v2855_v63  ;;  %v2923_v63 = vld [vmem:[%s3981_s5 + $0x2a4] ss:$24 sps:$4 sm:$0xff]  }
 0x243   :  { %2086 = vmatprep.subr.bf16.mxu0 %v2863_v0  ;;  %v2921_v0 = vld [vmem:[%s3981_s5 + $0x2a0] ss:$24 sps:$4 sm:$0xff]  }
 0x246   :  { %2087 = vmatpush1.bf16.msra.mxu0 %v2861_v1  ;;  %v2926_v1 = vld [vmem:[%s3981_s5 + $0x2ac] ss:$24 sps:$4 sm:$0xff]  }
 0x247   :  { %2088 = vmatprep.subr.bf16.mxu0 %v2869_v2  ;;  %v2924_v2 = vld [vmem:[%s3981_s5 + $0x2a8] ss:$24 sps:$4 sm:$0xff]  }
 0x24a   :  { %2089 = vmatpush1.bf16.msra.mxu0 %v2867_v3  ;;  %v2929_v3 = vld [vmem:[%s3981_s5 + $0x2d4] ss:$24 sps:$4 sm:$0xff]  }
 0x24b   :  { %2090 = vmatprep.subr.bf16.mxu0 %v2875_v4  ;;  %v2927_v4 = vld [vmem:[%s3981_s5 + $0x2d0] ss:$24 sps:$4 sm:$0xff]  }
 0x24e   :  { %2091 = vmatpush1.bf16.msra.mxu0 %v2873_v5  ;;  %v2932_v5 = vld [vmem:[%s3981_s5 + $0x2dc] ss:$24 sps:$4 sm:$0xff]  }
 0x24f   :  { %2092 = vmatprep.subr.bf16.mxu0 %v2881_v6  ;;  %v2930_v6 = vld [vmem:[%s3981_s5 + $0x2d8] ss:$24 sps:$4 sm:$0xff]  }
 0x252   :  { %2093 = vmatpush1.bf16.msra.mxu0 %v2879_v7  ;;  %v2935_v7 = vld [vmem:[%s3981_s5 + $0x14] ss:$24 sps:$4 sm:$0xff]  }
 0x253   :  { %2094 = vmatprep.subr.bf16.mxu0 %v2887_v8  ;;  %v1218_v8 = vld [vmem:[%s3982_s6 + $0x6] sm:$0x3] }
 0x256   :  { %2095 = vmatpush1.bf16.msra.mxu0 %v2885_v9  ;;  %v1258_v9 = vrot.slane %v1218_v8, %v3523_v32 }
 0x257   :  { %2096 = vmatprep.subr.bf16.mxu0 %v2893_v10  ;;  %v1262_v10 = vrot.slane %v1218_v8, %v3529_v34 }
 0x25a   :  { %2097 = vmatpush1.bf16.msra.mxu0 %v2891_v11 }
 0x25b   :  { %2098 = vmatprep.subr.bf16.mxu0 %v2899_v12 }
 0x25e   :  { %2099 = vmatpush1.bf16.msra.mxu0 %v2897_v13 }
 0x25f   :  { %2100 = vmatprep.subr.bf16.mxu0 %v2905_v14 }
 0x262   :  { %2101 = vmatpush1.bf16.msra.mxu0 %v2903_v15 }
 0x263   :  { %2102 = vmatprep.subr.bf16.mxu0 %v2911_v16 }
 0x266   :  { %2103 = vmatpush1.bf16.msra.mxu0 %v2909_v17 }
 0x267   :  { %2104 = vmatprep.subr.bf16.mxu0 %v2917_v18 }
 0x26a   :  { %2105 = vmatpush1.bf16.msra.mxu0 %v2915_v19 }
 0x26b   :  { %2106 = vmatprep.subr.bf16.mxu0 %v2923_v63 }
 0x26e   :  { %2107 = vmatpush1.bf16.msra.mxu0 %v2921_v0 }
 0x26f   :  { %2108 = vmatprep.subr.bf16.mxu0 %v2929_v3 }
 0x272   :  { %2109 = vmatpush1.bf16.msra.mxu0 %v2927_v4 }
 0x273   :  { %2160 = vmatprep.subr.bf16.mxu0 %v2935_v7 }
 0x308   :  { %v1209_v23 = vpop.f32.mrb[8].mxu0 }
 0x309   :  { %v1210_v24 = vadd.f32 %v1209_v23, %v1008_v21  ;;  %v1211_v25 = vpop.f32.mrb[9].mxu0  ;;  %v2936_v23 = vld [vmem:[%s3981_s5 + $0x40] ss:$24 sps:$4 sm:$0xff]  }
 0x30a   :  { %v1212_v26 = vadd.f32 %v1211_v25, %v1012_v22  ;;  %v1213_v27 = vpop.f32.mrb[10].mxu0  ;;  %v2938_v22 = vld [vmem:[%s3981_s5 + $0x44] ss:$24 sps:$4 sm:$0xff]   ;;  %v2939_v25 = vld [vmem:[%s3981_s5 + $0x70] ss:$24 sps:$4 sm:$0xff]  }
 0x30b   :  { %v1216_v28 = vmax.f32 %v1210_v24, 0.0  ;;  %v1214_v29 = vpop.f32.mrb[11].mxu0  ;;  %v2941_v24 = vld [vmem:[%s3981_s5 + $0x74] ss:$24 sps:$4 sm:$0xff]   ;;  %v2942_v27 = vld [vmem:[%s3981_s5 + $0xa0] ss:$24 sps:$4 sm:$0xff]  }
 0x30c   :  { %v1217_v30 = vmax.f32 %v1212_v26, 0.0  ;;  %v2944_v26 = vld [vmem:[%s3981_s5 + $0xa4] ss:$24 sps:$4 sm:$0xff]   ;;  %v2945_v29 = vld [vmem:[%s3981_s5 + $0xd0] ss:$24 sps:$4 sm:$0xff]  }
 0x30d   :  { %v1219_v36 = vpack.c.bf16 %v1216_v28, %v1216_v28  ;;  %v2947_v28 = vld [vmem:[%s3981_s5 + $0xd4] ss:$24 sps:$4 sm:$0xff]  }
 0x30e   :  { %v1220_v33 = vpack.c.bf16 %v1217_v30, %v1217_v30  ;;  %v2950_v30 = vld [vmem:[%s3981_s5 + $0x104] ss:$24 sps:$4 sm:$0xff]  }
 0x310   :  { %1457 = vmatprep.mubr.bf16.mxu1 %v1220_v33  ;;  %v2948_v33 = vld [vmem:[%s3981_s5 + $0x100] ss:$24 sps:$4 sm:$0xff]  }
 0x311   :  { %1458 = vmatmul.mubr.bf16.vlgmr.msra.gmra.mrb[8].mxu1 %v1219_v36  ;;  %v2951_v36 = vld [vmem:[%s3981_s5 + $0x130] ss:$24 sps:$4 sm:$0xff]  }
 0x312   :  { %2120 = vmatpush1.bf16.msra.mxu1 %v2840_v35  ;;  %v2953_v35 = vld [vmem:[%s3981_s5 + $0x134] ss:$24 sps:$4 sm:$0xff]  }
 0x313   :  { %2121 = vmatprep.subr.bf16.mxu1 %v2848_v37  ;;  %v2956_v37 = vld [vmem:[%s3981_s5 + $0x164] ss:$24 sps:$4 sm:$0xff]  }
 0x316   :  { %2122 = vmatpush1.bf16.msra.mxu1 %v2846_v38  ;;  %v2954_v38 = vld [vmem:[%s3981_s5 + $0x160] ss:$24 sps:$4 sm:$0xff]  }
 0x317   :  { %2123 = vmatprep.subr.bf16.mxu1 %v2854_v39  ;;  %v2959_v39 = vld [vmem:[%s3981_s5 + $0x194] ss:$24 sps:$4 sm:$0xff]  }
 0x31a   :  { %2124 = vmatpush1.bf16.msra.mxu1 %v2852_v40  ;;  %v2957_v40 = vld [vmem:[%s3981_s5 + $0x190] ss:$24 sps:$4 sm:$0xff]  }
 0x31b   :  { %2125 = vmatprep.subr.bf16.mxu1 %v2860_v41  ;;  %v2962_v41 = vld [vmem:[%s3981_s5 + $0x1c4] ss:$24 sps:$4 sm:$0xff]  }
 0x31e   :  { %2126 = vmatpush1.bf16.msra.mxu1 %v2858_v42  ;;  %v2960_v42 = vld [vmem:[%s3981_s5 + $0x1c0] ss:$24 sps:$4 sm:$0xff]  }
 0x31f   :  { %2127 = vmatprep.subr.bf16.mxu1 %v2866_v43  ;;  %v2965_v43 = vld [vmem:[%s3981_s5 + $0x1f4] ss:$24 sps:$4 sm:$0xff]  }
 0x322   :  { %2128 = vmatpush1.bf16.msra.mxu1 %v2864_v44  ;;  %v2963_v44 = vld [vmem:[%s3981_s5 + $0x1f0] ss:$24 sps:$4 sm:$0xff]  }
 0x323   :  { %2129 = vmatprep.subr.bf16.mxu1 %v2872_v45  ;;  %v2968_v45 = vld [vmem:[%s3981_s5 + $0x224] ss:$24 sps:$4 sm:$0xff]  }
 0x326   :  { %2130 = vmatpush1.bf16.msra.mxu1 %v2870_v46  ;;  %v2966_v46 = vld [vmem:[%s3981_s5 + $0x220] ss:$24 sps:$4 sm:$0xff]  }
 0x327   :  { %2131 = vmatprep.subr.bf16.mxu1 %v2878_v47  ;;  %v2971_v47 = vld [vmem:[%s3981_s5 + $0x254] ss:$24 sps:$4 sm:$0xff]  }
 0x32a   :  { %2132 = vmatpush1.bf16.msra.mxu1 %v2876_v48  ;;  %v2969_v48 = vld [vmem:[%s3981_s5 + $0x250] ss:$24 sps:$4 sm:$0xff]  }
 0x32b   :  { %2133 = vmatprep.subr.bf16.mxu1 %v2884_v49  ;;  %v2974_v49 = vld [vmem:[%s3981_s5 + $0x284] ss:$24 sps:$4 sm:$0xff]  }
 0x32e   :  { %2134 = vmatpush1.bf16.msra.mxu1 %v2882_v50  ;;  %v2972_v50 = vld [vmem:[%s3981_s5 + $0x280] ss:$24 sps:$4 sm:$0xff]  }
 0x32f   :  { %2135 = vmatprep.subr.bf16.mxu1 %v2890_v51  ;;  %v2977_v51 = vld [vmem:[%s3981_s5 + $0x2b4] ss:$24 sps:$4 sm:$0xff]  }
 0x332   :  { %2136 = vmatpush1.bf16.msra.mxu1 %v2888_v52  ;;  %v2975_v52 = vld [vmem:[%s3981_s5 + $0x2b0] ss:$24 sps:$4 sm:$0xff]  }
 0x333   :  { %2137 = vmatprep.subr.bf16.mxu1 %v2896_v53  ;;  %v2980_v53 = vld [vmem:[%s3981_s5 + $0x2e4] ss:$24 sps:$4 sm:$0xff]  }
 0x336   :  { %2138 = vmatpush1.bf16.msra.mxu1 %v2894_v54  ;;  %v2978_v54 = vld [vmem:[%s3981_s5 + $0x2e0] ss:$24 sps:$4 sm:$0xff]   ;;  %s3031_s5 = smov [#allocation5]  }
 0x337   :  { %2139 = vmatprep.subr.bf16.mxu1 %v2902_v55  ;;  %v1578_v55 = vsub.s32 2, %v3520_v31 }
 0x33a   :  { %2140 = vmatpush1.bf16.msra.mxu1 %v2900_v56  ;;  %v1468_v56 = vld [vmem:[%s3982_s6 + $0x8] sm:$0x3f]  ;;  %s2213_s6 = sshll.u32 %s3031_s5, 4  ;;  %s2214_s6 = int_to_ptr.vmem [resolvable:$true] %s2213_s6 }
 0x33b   :  { %2141 = vmatprep.subr.bf16.mxu1 %v2908_v57  ;;  %v1582_v57 = vsub.s32 3, %v3520_v31  ;;  %s3003_s26 = scalar_lea.vmem %s2214_s6, 768  ;;  %p3008_p9 = scmp.lt.s32.totalorder %s2214_s6, %s2214_s6 }
 0x33c   :  { %p3004_p8 = scmp.ne.s32.totalorder %s2214_s6, %s3003_s26  ;;  %p3009_p10 = scmp.lt.s32.totalorder %s3003_s26, %s3003_s26 }
 0x33e   :  { %2142 = vmatpush1.bf16.msra.mxu1 %v2906_v58  ;;  %v1571_v58 = vrot.slane %v1468_v56, %v3523_v32  ;;  %v1586_v32 = vsub.s32 4, %v3520_v31  ;;  %p3010_p11 = por %p3009_p10, %p3008_p9 }
 0x33f   :  { %2143 = vmatprep.subr.bf16.mxu1 %v2914_v59  ;;  %v1579_v59 = vrot.slane %v1468_v56, %v1578_v55 }
 0x340   :  { %p3011_p12 = pnand %p3010_p11, %p3004_p8 }
 0x342   :  { %2144 = vmatpush1.bf16.msra.mxu1 %v2912_v60  ;;  %v1575_v60 = vrot.slane %v1468_v56, %v3529_v34  ;;  %v1590_v34 = vsub.s32 5, %v3520_v31 }
 0x343   :  { %2145 = vmatprep.subr.bf16.mxu1 %v2920_v61  ;;  %v1583_v61 = vrot.slane %v1468_v56, %v1582_v57 }
 0x346   :  { %2146 = vmatpush1.bf16.msra.mxu1 %v2918_v62 }
 0x347   :  { %2147 = vmatprep.subr.bf16.mxu1 %v2926_v1 }
 0x34a   :  { %2148 = vmatpush1.bf16.msra.mxu1 %v2924_v2 }
 0x34b   :  { %2149 = vmatprep.subr.bf16.mxu1 %v2932_v5 }
 0x34e   :  { %2150 = vmatpush1.bf16.msra.mxu1 %v2930_v6 }
 0x3e4   :  { %v1459_v11 = vpop.f32.mrb[8].mxu1 }
 0x3e5   :  { %v1460_v12 = vadd.f32 %v1459_v11, %v1258_v9  ;;  %v1461_v13 = vpop.f32.mrb[9].mxu1  ;;  %v1591_v11 = vrot.slane %v1468_v56, %v1590_v34 }
 0x3e6   :  { %v1462_v14 = vadd.f32 %v1461_v13, %v1262_v10  ;;  %v1463_v15 = vpop.f32.mrb[10].mxu1  ;;  %v1587_v10 = vrot.slane %v1468_v56, %v1586_v32 }
 0x3e7   :  { %v1466_v16 = vmax.f32 %v1460_v12, 0.0  ;;  %v1464_v17 = vpop.f32.mrb[11].mxu1 }
 0x3e8   :  { %v1467_v18 = vmax.f32 %v1462_v14, 0.0 }
 0x3e9   :  { %v3859_v21 = vpack.c.bf16 %v1466_v16, %v1466_v16 }
 0x3ea   :  { %v1470_v19 = vpack.c.bf16 %v1467_v18, %v1467_v18 }
 0x3ec   :  { %2110 = vmatprep.mubr.bf16.mxu0 %v1470_v19  ;;  %2151 = vmatprep.mubr.bf16.mxu1 %v1470_v19 }
 0x3ed   :  { %2111 = vmatmul.mubr.bf16.vlgmr.msra.gmra.mrb[12].mxu0 %v3859_v21  ;;  %2152 = vmatmul.mubr.bf16.vlgmr.msra.gmra.mrb[12].mxu1 %v3859_v21 }
 0x3ee   :  { %2161 = vmatpush1.bf16.msra.mxu0 %v2933_v20  ;;  %2192 = vmatprep.mubr.bf16.mxu0 %v1470_v19 }
 0x3ef   :  { %2162 = vmatprep.subr.bf16.mxu0 %v2938_v22 }
 0x3f2   :  { %2163 = vmatpush1.bf16.msra.mxu0 %v2936_v23 }
 0x3f3   :  { %2164 = vmatprep.subr.bf16.mxu0 %v2941_v24 }
 0x3f6   :  { %2165 = vmatpush1.bf16.msra.mxu0 %v2939_v25 }
 0x3f7   :  { %2166 = vmatprep.subr.bf16.mxu0 %v2944_v26 }
 0x3fa   :  { %2167 = vmatpush1.bf16.msra.mxu0 %v2942_v27 }
 0x3fb   :  { %2168 = vmatprep.subr.bf16.mxu0 %v2947_v28 }
 0x3fe   :  { %2169 = vmatpush1.bf16.msra.mxu0 %v2945_v29 }
 0x3ff   :  { %2170 = vmatprep.subr.bf16.mxu0 %v2950_v30 }
 0x402   :  { %2171 = vmatpush1.bf16.msra.mxu0 %v2948_v33 }
 0x403   :  { %2172 = vmatprep.subr.bf16.mxu0 %v2953_v35 }
 0x406   :  { %2173 = vmatpush1.bf16.msra.mxu0 %v2951_v36 }
 0x407   :  { %2174 = vmatprep.subr.bf16.mxu0 %v2956_v37 }
 0x40a   :  { %2175 = vmatpush1.bf16.msra.mxu0 %v2954_v38 }
 0x40b   :  { %2176 = vmatprep.subr.bf16.mxu0 %v2959_v39 }
 0x40e   :  { %2177 = vmatpush1.bf16.msra.mxu0 %v2957_v40 }
 0x40f   :  { %2178 = vmatprep.subr.bf16.mxu0 %v2962_v41 }
 0x412   :  { %2179 = vmatpush1.bf16.msra.mxu0 %v2960_v42 }
 0x413   :  { %2180 = vmatprep.subr.bf16.mxu0 %v2965_v43 }
 0x416   :  { %2181 = vmatpush1.bf16.msra.mxu0 %v2963_v44 }
 0x417   :  { %2182 = vmatprep.subr.bf16.mxu0 %v2968_v45 }
 0x41a   :  { %2183 = vmatpush1.bf16.msra.mxu0 %v2966_v46 }
 0x41b   :  { %2184 = vmatprep.subr.bf16.mxu0 %v2971_v47 }
 0x41e   :  { %2185 = vmatpush1.bf16.msra.mxu0 %v2969_v48 }
 0x41f   :  { %2186 = vmatprep.subr.bf16.mxu0 %v2974_v49 }
 0x422   :  { %2187 = vmatpush1.bf16.msra.mxu0 %v2972_v50 }
 0x423   :  { %2188 = vmatprep.subr.bf16.mxu0 %v2977_v51 }
 0x426   :  { %2189 = vmatpush1.bf16.msra.mxu0 %v2975_v52 }
 0x427   :  { %2190 = vmatprep.subr.bf16.mxu0 %v2980_v53 }
 0x42a   :  { %2191 = vmatpush1.bf16.msra.mxu0 %v2978_v54 }
 0x42d   :  { %2193 = vmatmul.mubr.bf16.vlgmr.msra.gmra.mrb[16].mxu0 %v3859_v21 }
 0x4c0   :  { %v2112_v62 = vpop.f32.mrb[12].mxu0  ;;  %v2153_v63 = vpop.f32.mrb[12].mxu1 }
 0x4c1   :  { %v2113_v0 = vadd.f32 %v2112_v62, %v1571_v58  ;;  %v2154_v1 = vadd.f32 %v2153_v63, %v1579_v59  ;;  %v2114_v2 = vpop.f32.mrb[13].mxu0  ;;  %v2155_v3 = vpop.f32.mrb[13].mxu1 }
 0x4c2   :  { %v2115_v4 = vadd.f32 %v2114_v2, %v1575_v60  ;;  %v2156_v5 = vadd.f32 %v2155_v3, %v1583_v61  ;;  %v2116_v6 = vpop.f32.mrb[14].mxu0  ;;  %v2157_v7 = vpop.f32.mrb[14].mxu1 }
 0x4c3   :  { %2201 = vst [vmem:[#allocation5] sm:$0xff] %v2113_v0  ;;  %2203 = vst [vmem:[#allocation5 + $0x10] sm:$0xff] %v2154_v1  ;;  %v2117_v8 = vpop.f32.mrb[15].mxu0  ;;  %v2158_v9 = vpop.f32.mrb[15].mxu1 }
 0x4c4   :  { %2202 = vst [vmem:[#allocation5 + $0x8] sm:$0xff] %v2115_v4  ;;  %2204 = vst [vmem:[#allocation5 + $0x18] sm:$0xff] %v2156_v5 }
 0x500   :  { %v2194_v12 = vpop.f32.mrb[16].mxu0 }
 0x501   :  { %v2195_v13 = vadd.f32 %v2194_v12, %v1587_v10  ;;  %v2196_v14 = vpop.f32.mrb[17].mxu0 }
 0x502   :  { %v2197_v15 = vadd.f32 %v2196_v14, %v1591_v11  ;;  %v2198_v16 = vpop.f32.mrb[18].mxu0 }
 0x503   :  { %2205 = vst [vmem:[#allocation5 + $0x20] sm:$0xff] %v2195_v13  ;;  %v2199_v17 = vpop.f32.mrb[19].mxu0 }
 0x504   :  { %2206 = vst.msk [vmem:[#allocation5 + $0x28] sm:$0xff] %vm576_vm0, %v2197_v15 }
 0x505   :  { %3014 = shalt.err (!%p3011_p12)
}
 0x506   :  { %s3015_s3 = scalar_lea.hbm %s3983_s7, 768 }
 0x507   :  { %p3016_p13 = scmp.ne.s32.totalorder %s3983_s7, %s3015_s3  ;;  %p3019_p0 = scmp.lt.u32.totalorder %s3015_s3, %s3983_s7 }
 0x509   :  { %p3021_p1 = pnand %p3019_p0, %p3016_p13 }
 0x50b   :  { %3024 = shalt.err (!%p3021_p1)
}
 0x50c   :  { %2216 = dma.vmem_to_hbm [thread:$0]  %s2214_s6, 768, %s3983_s7, [#allocation4]  }
 0x50d   :  { %3027 = dma.done.wait [#allocation4], 768  }
 0x50e   :  { %3028 = vsyncadd [#allocation4], 4294966528 }
 0x50f   :  { %2220 = vsyncpa [#allocation3], 1 }
 0x510   :  { %2221 = vsyncpa [#allocation4], 1 }

</bundles_post_ra>
